<compile_context>
chip_gen: v7x
topology: tpu7x:2x2x1
jax: 0.10.0
libtpu: 0.0.40
codegen_flags: <defaults>
</compile_context>

<pallas_src>
import functools

import jax
import jax.numpy as jnp
from jax.experimental import pallas as pl
from jax.experimental.pallas import tpu as pltpu

# ---- stands in for configuration.LSTMConfig() ----
HIDDEN_SIZE = 32       # mconfig.hidden_size_encoder
EMBED_SIZE = 32        # mconfig.embed_size
RANK = 8               # mconfig.rank_encoder
NUM_LAYERS = 1         # mconfig.num_layers_encoder
BIDIRECTIONAL = True   # mconfig.bidirectional_encoder
DROPOUT = 0.0          # eval mode -> nn.Dropout is identity
VOCAB_SIZE = 100
CTX_PROJ = 32          # context_projection
STATE_PROJ = 32        # state_projection

VOCAB_PAD = ((VOCAB_SIZE + 127) // 128) * 128   # pad vocab to full 128-lane group


# ------------------------------------------------------------------
# Fused encoder kernel.
# Gate order follows PyTorch (i, f, g, o); the packed 8H axis is
# direction-interleaved per gate: [i_f|i_b | f_f|f_b | g_f|g_b | o_f|o_b],
# each block H wide.  h/c carries are (Bp, 2H) = [fwd | bwd] lanes.
# ------------------------------------------------------------------
def _encoder_kernel(tok_ref, table_ref, whh_ref,
                    wctx_ref, bctx_ref, wst_ref, bst_ref,
                    ctx_ref, st_ref,
                    ih_scr, outf_scr, outb_scr,
                    *, T, Bp, H):
    f32 = jnp.float32
    bf16 = jnp.bfloat16
    G = 8 * H

    # ---- prologue: embedding + input-gate projection fused into ONE matmul ----
    # one-hot(token) @ (VOCAB_PAD, 8H) table  (table = emb_A@emb_B@W_ih + b,
    # folded at pack time).  bf16 MXU operands, f32 accumulation.
    iota = jax.lax.broadcasted_iota(jnp.int32, (T * Bp, VOCAB_PAD), 1)
    onehot = (tok_ref[...] == iota).astype(bf16)
    ih_scr[...] = jnp.dot(onehot, table_ref[...], preferred_element_type=f32)

    # constant lane mask: within every 2H gate block, first H lanes = forward,
    # next H lanes = backward.  Hoisted out of the recurrence.
    lane = jax.lax.broadcasted_iota(jnp.int32, (Bp, G), 1)
    fwd_mask = (lane % (2 * H)) < H

    # carries (no per-step concats / re-slices)
    h = jnp.zeros((Bp, 2 * H), f32)
    c = jnp.zeros((Bp, 2 * H), f32)

    # T is small and static -> full unroll at trace time, single serial loop
    # covering BOTH directions (backward runs time-reversed).
    # TODO(synk): switch to lax.fori_loop(..., unroll=2..4) + pl.multiple_of on
    # row offsets once T grows beyond ~32 (code size / vreg live ranges).
    for s in range(T):
        rf = s * Bp                 # forward processes time step s
        rb = (T - 1 - s) * Bp       # backward processes time step T-1-s

        # merge time-mismatched fwd/bwd input-gate terms with one select
        ih_s = jnp.where(fwd_mask, ih_scr[rf:rf + Bp, :], ih_scr[rb:rb + Bp, :])

        # ONE lane-dense recurrent matmul for both directions:
        # (Bp, 2H) @ block-structured (2H, 8H); bf16 inputs, f32 accumulation.
        gates = ih_s + jnp.dot(h.astype(bf16), whh_ref[...],
                               preferred_element_type=f32)

        # single fused LSTM cell over both directions (5 EUP pushes / step)
        i_g = jax.nn.sigmoid(gates[:, 0 * H:2 * H])
        f_g = jax.nn.sigmoid(gates[:, 2 * H:4 * H])
        g_g = jnp.tanh(gates[:, 4 * H:6 * H])
        o_g = jax.nn.sigmoid(gates[:, 6 * H:8 * H])
        c = f_g * c + i_g * g_g
        h = o_g * jnp.tanh(c)

        outf_scr[rf:rf + Bp, :] = h[:, :H]     # fwd hidden of time step s
        outb_scr[rb:rb + Bp, :] = h[:, H:]     # bwd hidden of time step T-1-s

    # ---- fused epilogue (off the recurrence critical path) ----
    # context projection tanh([out_f | out_b] @ W_ctx + b_ctx) as a sum of two
    # partial matmuls (no (T*Bp, 2H) lane-concat materialization).
    ctx = (jnp.dot(outf_scr[...].astype(bf16), wctx_ref[:H, :],
                   preferred_element_type=f32)
           + jnp.dot(outb_scr[...].astype(bf16), wctx_ref[H:, :],
                     preferred_element_type=f32)
           + bctx_ref[...])
    ctx_ref[...] = jnp.tanh(ctx).astype(ctx_ref.dtype)

    # decoder init state: tanh([h_fwd_last | h_bwd_last] @ W_st + b_st).
    # After the loop, h already holds exactly [h_fwd(T-1) | h_bwd(0)].
    st = jnp.dot(h.astype(bf16), wst_ref[...],
                 preferred_element_type=f32) + bst_ref[...]
    st_ref[...] = jnp.tanh(st).astype(st_ref.dtype)


# ------------------------------------------------------------------
# Weight packing.
#   table : (VOCAB_PAD, 8H) bf16 = emb_A @ emb_B @ W_ih (interleaved) + bias
#   whh   : (2H, 8H)       bf16, block-structured (fwd h -> fwd gate lanes,
#                                bwd h -> bwd gate lanes), direction-interleaved
# NOTE: PyTorch nn.LSTM has two bias vectors per gate (b_ih and b_hh); when
# importing real weights pack b = b_ih + b_hh here.
# ------------------------------------------------------------------
def _pack_weights(p):
    H = HIDDEN_SIZE
    z = jnp.zeros((H, H), jnp.float32)
    cols_in, rows_f, rows_b, bias = [], [], [], []
    for g in range(4):                       # PyTorch gate order i, f, g, o
        cols_in += [p["wih_f"][g], p["wih_b"][g]]
        rows_f += [p["whh_f"][g], z]
        rows_b += [z, p["whh_b"][g]]
        bias += [p["b_f"][g], p["b_b"][g]]
    w_in = jnp.concatenate(cols_in, axis=-1)                        # (E, 8H)
    whh = jnp.concatenate([jnp.concatenate(rows_f, axis=-1),
                           jnp.concatenate(rows_b, axis=-1)], 0)    # (2H, 8H)
    bih = jnp.concatenate(bias, axis=-1)                            # (1, 8H)

    # whole factorized embedding composed with the input projection + bias
    table = (p["emb_A"] @ p["emb_B"]) @ w_in + bih                  # (V, 8H)
    table = jnp.pad(table, ((0, VOCAB_PAD - VOCAB_SIZE), (0, 0)))
    return table.astype(jnp.bfloat16), whh.astype(jnp.bfloat16)


# ------------------------------------------------------------------
# Encoder forward
# ------------------------------------------------------------------
def encoder_forward(params, tokens):
    B, T = tokens.shape
    H = HIDDEN_SIZE
    Bp = ((B + 7) // 8) * 8            # pad batch to a full sublane

    # Only the tiny int32 token matrix is rearranged host-side; the embedding
    # gather itself happens INSIDE the kernel (one-hot matmul against the
    # folded gate table) -> no gathered-float HBM round-trip.
    # TODO(synk): variable-length packed sequences (pack/pad_packed) are not
    # modeled; equal-length batch assumed.  Padded batch rows B..Bp-1 run the
    # recurrence with token-0 data and are sliced off afterwards (safe: every
    # op is row-wise; do not add batch-axis reductions without masking).
    tok_tm = jnp.pad(jnp.transpose(tokens), ((0, 0), (0, Bp - B)))   # (T, Bp)
    tok_tm = tok_tm.reshape(T * Bp, 1).astype(jnp.int32)

    table, whh = _pack_weights(params)

    ctx_flat, st = pl.pallas_call(
        functools.partial(_encoder_kernel, T=T, Bp=Bp, H=H),
        out_shape=(
            jax.ShapeDtypeStruct((T * Bp, CTX_PROJ), jnp.float32),
            jax.ShapeDtypeStruct((Bp, STATE_PROJ), jnp.float32),
        ),
        scratch_shapes=[
            pltpu.VMEM((T * Bp, 8 * H), jnp.float32),   # packed gate pre-acts
            pltpu.VMEM((T * Bp, H), jnp.float32),       # fwd hidden per step
            pltpu.VMEM((T * Bp, H), jnp.float32),       # bwd hidden per step
        ],
        compiler_params=pltpu.CompilerParams(
            # fully VMEM-resident (~0.25 MiB scratch + weights); explicit,
            # generation-safe limit (v7x physical VMEM is only 64 MiB).
            vmem_limit_bytes=16 * 1024 * 1024,
        ),
    )(tok_tm,
      table,
      whh,
      params["w_ctx"].astype(jnp.bfloat16), params["b_ctx"],
      params["w_st"].astype(jnp.bfloat16), params["b_st"])
    # TODO(synk): on v7x the two directions could be split across the two
    # TensorCores (core_map); only worthwhile once T makes the recurrence
    # dominate launch/barrier cost.

    context_pad = ctx_flat.reshape(T, Bp, CTX_PROJ)[:, :B, :]        # (T, B, CTX)
    state = st[:B].reshape(NUM_LAYERS, B, STATE_PROJ)                # (1, B, ST)
    return context_pad, state


# ------------------------------------------------------------------
# Deterministic parameter init (synthetic; shapes follow Encoder.__init__,
# gate order i, f, g, o as in PyTorch)
# ------------------------------------------------------------------
def init_params(key):
    keys = jax.random.split(key, 10)
    s = 0.1
    p = {}
    p["emb_A"] = s * jax.random.normal(keys[0], (VOCAB_SIZE, RANK), jnp.float32)
    p["emb_B"] = s * jax.random.normal(keys[1], (RANK, EMBED_SIZE), jnp.float32)
    for d, kw, kh in (("f", 2, 3), ("b", 4, 5)):
        p[f"wih_{d}"] = s * jax.random.normal(
            keys[kw], (4, EMBED_SIZE, HIDDEN_SIZE), jnp.float32)
        p[f"whh_{d}"] = s * jax.random.normal(
            keys[kh], (4, HIDDEN_SIZE, HIDDEN_SIZE), jnp.float32)
        p[f"b_{d}"] = jnp.zeros((4, 1, HIDDEN_SIZE), jnp.float32)
    p["w_ctx"] = s * jax.random.normal(keys[6], (2 * HIDDEN_SIZE, CTX_PROJ), jnp.float32)
    p["b_ctx"] = jnp.zeros((1, CTX_PROJ), jnp.float32)
    p["w_st"] = s * jax.random.normal(keys[7], (2 * HIDDEN_SIZE, STATE_PROJ), jnp.float32)
    p["b_st"] = jnp.zeros((1, STATE_PROJ), jnp.float32)
    return p


if __name__ == "__main__":
    key = jax.random.PRNGKey(0)
    pkey, tkey = jax.random.split(key)
    params = init_params(pkey)

    B, T = 2, 8
    tokens = jax.random.randint(tkey, (B, T), 0, VOCAB_SIZE, dtype=jnp.int32)

    context, state = jax.jit(encoder_forward)(params, tokens)
    jax.block_until_ready((context, state))

    assert context.shape == (T, B, CTX_PROJ)
    assert state.shape == (NUM_LAYERS, B, STATE_PROJ)
    print("KERNEL_OK")
</pallas_src>

<mosaic_0001>
module attributes {stable_mosaic.version = 11 : i64} {
  func.func @_encoder_kernel(%arg0: memref<64x1xi32, #tpu.memory_space<vmem>>, %arg1: memref<128x256xbf16, #tpu.memory_space<vmem>>, %arg2: memref<64x256xbf16, #tpu.memory_space<vmem>>, %arg3: memref<64x32xbf16, #tpu.memory_space<vmem>>, %arg4: memref<1x32xf32, #tpu.memory_space<vmem>>, %arg5: memref<64x32xbf16, #tpu.memory_space<vmem>>, %arg6: memref<1x32xf32, #tpu.memory_space<vmem>>, %arg7: memref<64x32xf32, #tpu.memory_space<vmem>>, %arg8: memref<8x32xf32, #tpu.memory_space<vmem>>, %arg9: memref<64x256xf32, #tpu.memory_space<vmem>>, %arg10: memref<64x32xf32, #tpu.memory_space<vmem>>, %arg11: memref<64x32xf32, #tpu.memory_space<vmem>>) attributes {dimension_semantics = [], scalar_prefetch = 0 : i64, scratch_operands = 3 : i64, tpu.core_type = #tpu.core_type<tc>} {
    %0 = tpu.iota {dimensions = array<i32: 1>} : vector<64x128xi32>
    %c0 = arith.constant 0 : index
    %c0_0 = arith.constant 0 : index
    %1 = vector.load %arg0[%c0, %c0_0] : memref<64x1xi32, #tpu.memory_space<vmem>>, vector<64x1xi32>
    %2 = vector.broadcast %1 : vector<64x1xi32> to vector<64x128xi32>
    %3 = arith.cmpi eq, %2, %0 : vector<64x128xi32>
    %4 = arith.extui %3 : vector<64x128xi1> to vector<64x128xi32>
    %5 = arith.sitofp %4 : vector<64x128xi32> to vector<64x128xf32>
    %6 = arith.truncf %5 : vector<64x128xf32> to vector<64x128xbf16>
    %c0_1 = arith.constant 0 : index
    %c0_2 = arith.constant 0 : index
    %7 = vector.load %arg1[%c0_1, %c0_2] : memref<128x256xbf16, #tpu.memory_space<vmem>>, vector<128x256xbf16>
    %cst = arith.constant dense<0.000000e+00> : vector<64x256xf32>
    %8 = tpu.matmul %6, %7, %cst {dimension_numbers = #tpu.dot_dimension_numbers<[1], [0], [0], [1], [0, 0, 1, 1], [], []>} : vector<64x128xbf16>, vector<128x256xbf16>, vector<64x256xf32> -> vector<64x256xf32>
    %c0_3 = arith.constant 0 : index
    %c0_4 = arith.constant 0 : index
    %9 = vector.load %arg9[%c0_3, %c0_4] : memref<64x256xf32, #tpu.memory_space<vmem>>, vector<64x256xf32>
    tpu.vector_store %arg9[%c0_3, %c0_4], %8 {strides = array<i32>} : memref<64x256xf32, #tpu.memory_space<vmem>>, vector<64x256xf32>,
    %10 = tpu.iota {dimensions = array<i32: 1>} : vector<8x256xi32>
    %c64_i32 = arith.constant 64 : i32
    %c0_i32 = arith.constant 0 : i32
    %11 = arith.cmpi eq, %c64_i32, %c0_i32 : i32
    %c1_i32 = arith.constant 1 : i32
    %12 = arith.select %11, %c1_i32, %c64_i32 : i32
    %13 = vector.broadcast %12 : i32 to vector<8x256xi32>
    %14 = arith.remsi %10, %13 : vector<8x256xi32>
    %c0_i32_5 = arith.constant 0 : i32
    %15 = vector.broadcast %c0_i32_5 : i32 to vector<8x256xi32>
    %16 = arith.cmpi ne, %14, %15 : vector<8x256xi32>
    %c0_i32_6 = arith.constant 0 : i32
    %17 = vector.broadcast %c0_i32_6 : i32 to vector<8x256xi32>
    %18 = arith.cmpi slt, %14, %17 : vector<8x256xi32>
    %c0_i32_7 = arith.constant 0 : i32
    %19 = arith.cmpi slt, %12, %c0_i32_7 : i32
    %20 = vector.broadcast %19 : i1 to vector<8x256xi1>
    %21 = vector.broadcast %20 : vector<8x256xi1> to vector<8x256xi1>
    %22 = arith.xori %18, %21 : vector<8x256xi1>
    %23 = arith.andi %22, %16 : vector<8x256xi1>
    %24 = vector.broadcast %12 : i32 to vector<8x256xi32>
    %25 = arith.addi %14, %24 : vector<8x256xi32>
    %26 = arith.select %23, %25, %14 : vector<8x256xi1>, vector<8x256xi32>
    %c32_i32 = arith.constant 32 : i32
    %27 = vector.broadcast %c32_i32 : i32 to vector<8x256xi32>
    %28 = arith.cmpi slt, %26, %27 : vector<8x256xi32>
    %cst_8 = arith.constant 0.000000e+00 : f32
    %29 = vector.broadcast %cst_8 : f32 to vector<8x64xf32>
    %cst_9 = arith.constant 0.000000e+00 : f32
    %30 = vector.broadcast %cst_9 : f32 to vector<8x64xf32>
    %c0_10 = arith.constant 0 : index
    %c0_11 = arith.constant 0 : index
    %31 = vector.load %arg9[%c0_10, %c0_11] : memref<64x256xf32, #tpu.memory_space<vmem>>, vector<8x256xf32>
    %c56 = arith.constant 56 : index
    %c0_12 = arith.constant 0 : index
    %32 = vector.load %arg9[%c56, %c0_12] : memref<64x256xf32, #tpu.memory_space<vmem>>, vector<8x256xf32>
    %33 = arith.select %28, %31, %32 : vector<8x256xi1>, vector<8x256xf32>
    %34 = arith.truncf %29 : vector<8x64xf32> to vector<8x64xbf16>
    %c0_13 = arith.constant 0 : index
    %c0_14 = arith.constant 0 : index
    %35 = vector.load %arg2[%c0_13, %c0_14] : memref<64x256xbf16, #tpu.memory_space<vmem>>, vector<64x256xbf16>
    %cst_15 = arith.constant dense<0.000000e+00> : vector<8x256xf32>
    %36 = tpu.matmul %34, %35, %cst_15 {dimension_numbers = #tpu.dot_dimension_numbers<[1], [0], [0], [1], [0, 0, 1, 1], [], []>} : vector<8x64xbf16>, vector<64x256xbf16>, vector<8x256xf32> -> vector<8x256xf32>
    %37 = arith.addf %33, %36 : vector<8x256xf32>
    %38 = vector.extract_strided_slice %37 {offsets = [0, 0], sizes = [8, 64], strides = [1, 1]} : vector<8x256xf32> to vector<8x64xf32>
    %39 = arith.negf %38 : vector<8x64xf32>
    %40 = math.exp %39 : vector<8x64xf32>
    %cst_16 = arith.constant 1.000000e+00 : f32
    %41 = vector.broadcast %cst_16 : f32 to vector<8x64xf32>
    %42 = arith.addf %41, %40 : vector<8x64xf32>
    %43 = arith.divf %41, %42 : vector<8x64xf32>
    %44 = vector.extract_strided_slice %37 {offsets = [0, 64], sizes = [8, 64], strides = [1, 1]} : vector<8x256xf32> to vector<8x64xf32>
    %45 = arith.negf %44 : vector<8x64xf32>
    %46 = math.exp %45 : vector<8x64xf32>
    %cst_17 = arith.constant 1.000000e+00 : f32
    %47 = vector.broadcast %cst_17 : f32 to vector<8x64xf32>
    %48 = arith.addf %47, %46 : vector<8x64xf32>
    %49 = arith.divf %47, %48 : vector<8x64xf32>
    %50 = vector.extract_strided_slice %37 {offsets = [0, 128], sizes = [8, 64], strides = [1, 1]} : vector<8x256xf32> to vector<8x64xf32>
    %51 = math.tanh %50 : vector<8x64xf32>
    %52 = vector.extract_strided_slice %37 {offsets = [0, 192], sizes = [8, 64], strides = [1, 1]} : vector<8x256xf32> to vector<8x64xf32>
    %53 = arith.negf %52 : vector<8x64xf32>
    %54 = math.exp %53 : vector<8x64xf32>
    %cst_18 = arith.constant 1.000000e+00 : f32
    %55 = vector.broadcast %cst_18 : f32 to vector<8x64xf32>
    %56 = arith.addf %55, %54 : vector<8x64xf32>
    %57 = arith.divf %55, %56 : vector<8x64xf32>
    %58 = arith.mulf %49, %30 : vector<8x64xf32>
    %59 = arith.mulf %43, %51 : vector<8x64xf32>
    %60 = arith.addf %58, %59 : vector<8x64xf32>
    %61 = math.tanh %60 : vector<8x64xf32>
    %62 = arith.mulf %57, %61 : vector<8x64xf32>
    %63 = vector.extract_strided_slice %62 {offsets = [0, 0], sizes = [8, 32], strides = [1, 1]} : vector<8x64xf32> to vector<8x32xf32>
    %c0_19 = arith.constant 0 : index
    %c0_20 = arith.constant 0 : index
    %64 = vector.load %arg10[%c0_19, %c0_20] : memref<64x32xf32, #tpu.memory_space<vmem>>, vector<8x32xf32>
    tpu.vector_store %arg10[%c0_19, %c0_20], %63 {strides = array<i32>} : memref<64x32xf32, #tpu.memory_space<vmem>>, vector<8x32xf32>,
    %65 = vector.extract_strided_slice %62 {offsets = [0, 32], sizes = [8, 32], strides = [1, 1]} : vector<8x64xf32> to vector<8x32xf32>
    %c56_21 = arith.constant 56 : index
    %c0_22 = arith.constant 0 : index
    %66 = vector.load %arg11[%c56_21, %c0_22] : memref<64x32xf32, #tpu.memory_space<vmem>>, vector<8x32xf32>
    tpu.vector_store %arg11[%c56_21, %c0_22], %65 {strides = array<i32>} : memref<64x32xf32, #tpu.memory_space<vmem>>, vector<8x32xf32>,
    %c8 = arith.constant 8 : index
    %c0_23 = arith.constant 0 : index
    %67 = vector.load %arg9[%c8, %c0_23] : memref<64x256xf32, #tpu.memory_space<vmem>>, vector<8x256xf32>
    %c48 = arith.constant 48 : index
    %c0_24 = arith.constant 0 : index
    %68 = vector.load %arg9[%c48, %c0_24] : memref<64x256xf32, #tpu.memory_space<vmem>>, vector<8x256xf32>
    %69 = arith.select %28, %67, %68 : vector<8x256xi1>, vector<8x256xf32>
    %70 = arith.truncf %62 : vector<8x64xf32> to vector<8x64xbf16>
    %c0_25 = arith.constant 0 : index
    %c0_26 = arith.constant 0 : index
    %71 = vector.load %arg2[%c0_25, %c0_26] : memref<64x256xbf16, #tpu.memory_space<vmem>>, vector<64x256xbf16>
    %cst_27 = arith.constant dense<0.000000e+00> : vector<8x256xf32>
    %72 = tpu.matmul %70, %71, %cst_27 {dimension_numbers = #tpu.dot_dimension_numbers<[1], [0], [0], [1], [0, 0, 1, 1], [], []>} : vector<8x64xbf16>, vector<64x256xbf16>, vector<8x256xf32> -> vector<8x256xf32>
    %73 = arith.addf %69, %72 : vector<8x256xf32>
    %74 = vector.extract_strided_slice %73 {offsets = [0, 0], sizes = [8, 64], strides = [1, 1]} : vector<8x256xf32> to vector<8x64xf32>
    %75 = arith.negf %74 : vector<8x64xf32>
    %76 = math.exp %75 : vector<8x64xf32>
    %cst_28 = arith.constant 1.000000e+00 : f32
    %77 = vector.broadcast %cst_28 : f32 to vector<8x64xf32>
    %78 = arith.addf %77, %76 : vector<8x64xf32>
    %79 = arith.divf %77, %78 : vector<8x64xf32>
    %80 = vector.extract_strided_slice %73 {offsets = [0, 64], sizes = [8, 64], strides = [1, 1]} : vector<8x256xf32> to vector<8x64xf32>
    %81 = arith.negf %80 : vector<8x64xf32>
    %82 = math.exp %81 : vector<8x64xf32>
    %cst_29 = arith.constant 1.000000e+00 : f32
    %83 = vector.broadcast %cst_29 : f32 to vector<8x64xf32>
    %84 = arith.addf %83, %82 : vector<8x64xf32>
    %85 = arith.divf %83, %84 : vector<8x64xf32>
    %86 = vector.extract_strided_slice %73 {offsets = [0, 128], sizes = [8, 64], strides = [1, 1]} : vector<8x256xf32> to vector<8x64xf32>
    %87 = math.tanh %86 : vector<8x64xf32>
    %88 = vector.extract_strided_slice %73 {offsets = [0, 192], sizes = [8, 64], strides = [1, 1]} : vector<8x256xf32> to vector<8x64xf32>
    %89 = arith.negf %88 : vector<8x64xf32>
    %90 = math.exp %89 : vector<8x64xf32>
    %cst_30 = arith.constant 1.000000e+00 : f32
    %91 = vector.broadcast %cst_30 : f32 to vector<8x64xf32>
    %92 = arith.addf %91, %90 : vector<8x64xf32>
    %93 = arith.divf %91, %92 : vector<8x64xf32>
    %94 = arith.mulf %85, %60 : vector<8x64xf32>
    %95 = arith.mulf %79, %87 : vector<8x64xf32>
    %96 = arith.addf %94, %95 : vector<8x64xf32>
    %97 = math.tanh %96 : vector<8x64xf32>
    %98 = arith.mulf %93, %97 : vector<8x64xf32>
    %99 = vector.extract_strided_slice %98 {offsets = [0, 0], sizes = [8, 32], strides = [1, 1]} : vector<8x64xf32> to vector<8x32xf32>
    %c8_31 = arith.constant 8 : index
    %c0_32 = arith.constant 0 : index
    %100 = vector.load %arg10[%c8_31, %c0_32] : memref<64x32xf32, #tpu.memory_space<vmem>>, vector<8x32xf32>
    tpu.vector_store %arg10[%c8_31, %c0_32], %99 {strides = array<i32>} : memref<64x32xf32, #tpu.memory_space<vmem>>, vector<8x32xf32>,
    %101 = vector.extract_strided_slice %98 {offsets = [0, 32], sizes = [8, 32], strides = [1, 1]} : vector<8x64xf32> to vector<8x32xf32>
    %c48_33 = arith.constant 48 : index
    %c0_34 = arith.constant 0 : index
    %102 = vector.load %arg11[%c48_33, %c0_34] : memref<64x32xf32, #tpu.memory_space<vmem>>, vector<8x32xf32>
    tpu.vector_store %arg11[%c48_33, %c0_34], %101 {strides = array<i32>} : memref<64x32xf32, #tpu.memory_space<vmem>>, vector<8x32xf32>,
    %c16 = arith.constant 16 : index
    %c0_35 = arith.constant 0 : index
    %103 = vector.load %arg9[%c16, %c0_35] : memref<64x256xf32, #tpu.memory_space<vmem>>, vector<8x256xf32>
    %c40 = arith.constant 40 : index
    %c0_36 = arith.constant 0 : index
    %104 = vector.load %arg9[%c40, %c0_36] : memref<64x256xf32, #tpu.memory_space<vmem>>, vector<8x256xf32>
    %105 = arith.select %28, %103, %104 : vector<8x256xi1>, vector<8x256xf32>
    %106 = arith.truncf %98 : vector<8x64xf32> to vector<8x64xbf16>
    %c0_37 = arith.constant 0 : index
    %c0_38 = arith.constant 0 : index
    %107 = vector.load %arg2[%c0_37, %c0_38] : memref<64x256xbf16, #tpu.memory_space<vmem>>, vector<64x256xbf16>
    %cst_39 = arith.constant dense<0.000000e+00> : vector<8x256xf32>
    %108 = tpu.matmul %106, %107, %cst_39 {dimension_numbers = #tpu.dot_dimension_numbers<[1], [0], [0], [1], [0, 0, 1, 1], [], []>} : vector<8x64xbf16>, vector<64x256xbf16>, vector<8x256xf32> -> vector<8x256xf32>
    %109 = arith.addf %105, %108 : vector<8x256xf32>
    %110 = vector.extract_strided_slice %109 {offsets = [0, 0], sizes = [8, 64], strides = [1, 1]} : vector<8x256xf32> to vector<8x64xf32>
    %111 = arith.negf %110 : vector<8x64xf32>
    %112 = math.exp %111 : vector<8x64xf32>
    %cst_40 = arith.constant 1.000000e+00 : f32
    %113 = vector.broadcast %cst_40 : f32 to vector<8x64xf32>
    %114 = arith.addf %113, %112 : vector<8x64xf32>
    %115 = arith.divf %113, %114 : vector<8x64xf32>
    %116 = vector.extract_strided_slice %109 {offsets = [0, 64], sizes = [8, 64], strides = [1, 1]} : vector<8x256xf32> to vector<8x64xf32>
    %117 = arith.negf %116 : vector<8x64xf32>
    %118 = math.exp %117 : vector<8x64xf32>
    %cst_41 = arith.constant 1.000000e+00 : f32
    %119 = vector.broadcast %cst_41 : f32 to vector<8x64xf32>
    %120 = arith.addf %119, %118 : vector<8x64xf32>
    %121 = arith.divf %119, %120 : vector<8x64xf32>
    %122 = vector.extract_strided_slice %109 {offsets = [0, 128], sizes = [8, 64], strides = [1, 1]} : vector<8x256xf32> to vector<8x64xf32>
    %123 = math.tanh %122 : vector<8x64xf32>
    %124 = vector.extract_strided_slice %109 {offsets = [0, 192], sizes = [8, 64], strides = [1, 1]} : vector<8x256xf32> to vector<8x64xf32>
    %125 = arith.negf %124 : vector<8x64xf32>
    %126 = math.exp %125 : vector<8x64xf32>
    %cst_42 = arith.constant 1.000000e+00 : f32
    %127 = vector.broadcast %cst_42 : f32 to vector<8x64xf32>
    %128 = arith.addf %127, %126 : vector<8x64xf32>
    %129 = arith.divf %127, %128 : vector<8x64xf32>
    %130 = arith.mulf %121, %96 : vector<8x64xf32>
    %131 = arith.mulf %115, %123 : vector<8x64xf32>
    %132 = arith.addf %130, %131 : vector<8x64xf32>
    %133 = math.tanh %132 : vector<8x64xf32>
    %134 = arith.mulf %129, %133 : vector<8x64xf32>
    %135 = vector.extract_strided_slice %134 {offsets = [0, 0], sizes = [8, 32], strides = [1, 1]} : vector<8x64xf32> to vector<8x32xf32>
    %c16_43 = arith.constant 16 : index
    %c0_44 = arith.constant 0 : index
    %136 = vector.load %arg10[%c16_43, %c0_44] : memref<64x32xf32, #tpu.memory_space<vmem>>, vector<8x32xf32>
    tpu.vector_store %arg10[%c16_43, %c0_44], %135 {strides = array<i32>} : memref<64x32xf32, #tpu.memory_space<vmem>>, vector<8x32xf32>,
    %137 = vector.extract_strided_slice %134 {offsets = [0, 32], sizes = [8, 32], strides = [1, 1]} : vector<8x64xf32> to vector<8x32xf32>
    %c40_45 = arith.constant 40 : index
    %c0_46 = arith.constant 0 : index
    %138 = vector.load %arg11[%c40_45, %c0_46] : memref<64x32xf32, #tpu.memory_space<vmem>>, vector<8x32xf32>
    tpu.vector_store %arg11[%c40_45, %c0_46], %137 {strides = array<i32>} : memref<64x32xf32, #tpu.memory_space<vmem>>, vector<8x32xf32>,
    %c24 = arith.constant 24 : index
    %c0_47 = arith.constant 0 : index
    %139 = vector.load %arg9[%c24, %c0_47] : memref<64x256xf32, #tpu.memory_space<vmem>>, vector<8x256xf32>
    %c32 = arith.constant 32 : index
    %c0_48 = arith.constant 0 : index
    %140 = vector.load %arg9[%c32, %c0_48] : memref<64x256xf32, #tpu.memory_space<vmem>>, vector<8x256xf32>
    %141 = arith.select %28, %139, %140 : vector<8x256xi1>, vector<8x256xf32>
    %142 = arith.truncf %134 : vector<8x64xf32> to vector<8x64xbf16>
    %c0_49 = arith.constant 0 : index
    %c0_50 = arith.constant 0 : index
    %143 = vector.load %arg2[%c0_49, %c0_50] : memref<64x256xbf16, #tpu.memory_space<vmem>>, vector<64x256xbf16>
    %cst_51 = arith.constant dense<0.000000e+00> : vector<8x256xf32>
    %144 = tpu.matmul %142, %143, %cst_51 {dimension_numbers = #tpu.dot_dimension_numbers<[1], [0], [0], [1], [0, 0, 1, 1], [], []>} : vector<8x64xbf16>, vector<64x256xbf16>, vector<8x256xf32> -> vector<8x256xf32>
    %145 = arith.addf %141, %144 : vector<8x256xf32>
    %146 = vector.extract_strided_slice %145 {offsets = [0, 0], sizes = [8, 64], strides = [1, 1]} : vector<8x256xf32> to vector<8x64xf32>
    %147 = arith.negf %146 : vector<8x64xf32>
    %148 = math.exp %147 : vector<8x64xf32>
    %cst_52 = arith.constant 1.000000e+00 : f32
    %149 = vector.broadcast %cst_52 : f32 to vector<8x64xf32>
    %150 = arith.addf %149, %148 : vector<8x64xf32>
    %151 = arith.divf %149, %150 : vector<8x64xf32>
    %152 = vector.extract_strided_slice %145 {offsets = [0, 64], sizes = [8, 64], strides = [1, 1]} : vector<8x256xf32> to vector<8x64xf32>
    %153 = arith.negf %152 : vector<8x64xf32>
    %154 = math.exp %153 : vector<8x64xf32>
    %cst_53 = arith.constant 1.000000e+00 : f32
    %155 = vector.broadcast %cst_53 : f32 to vector<8x64xf32>
    %156 = arith.addf %155, %154 : vector<8x64xf32>
    %157 = arith.divf %155, %156 : vector<8x64xf32>
    %158 = vector.extract_strided_slice %145 {offsets = [0, 128], sizes = [8, 64], strides = [1, 1]} : vector<8x256xf32> to vector<8x64xf32>
    %159 = math.tanh %158 : vector<8x64xf32>
    %160 = vector.extract_strided_slice %145 {offsets = [0, 192], sizes = [8, 64], strides = [1, 1]} : vector<8x256xf32> to vector<8x64xf32>
    %161 = arith.negf %160 : vector<8x64xf32>
    %162 = math.exp %161 : vector<8x64xf32>
    %cst_54 = arith.constant 1.000000e+00 : f32
    %163 = vector.broadcast %cst_54 : f32 to vector<8x64xf32>
    %164 = arith.addf %163, %162 : vector<8x64xf32>
    %165 = arith.divf %163, %164 : vector<8x64xf32>
    %166 = arith.mulf %157, %132 : vector<8x64xf32>
    %167 = arith.mulf %151, %159 : vector<8x64xf32>
    %168 = arith.addf %166, %167 : vector<8x64xf32>
    %169 = math.tanh %168 : vector<8x64xf32>
    %170 = arith.mulf %165, %169 : vector<8x64xf32>
    %171 = vector.extract_strided_slice %170 {offsets = [0, 0], sizes = [8, 32], strides = [1, 1]} : vector<8x64xf32> to vector<8x32xf32>
    %c24_55 = arith.constant 24 : index
    %c0_56 = arith.constant 0 : index
    %172 = vector.load %arg10[%c24_55, %c0_56] : memref<64x32xf32, #tpu.memory_space<vmem>>, vector<8x32xf32>
    tpu.vector_store %arg10[%c24_55, %c0_56], %171 {strides = array<i32>} : memref<64x32xf32, #tpu.memory_space<vmem>>, vector<8x32xf32>,
    %173 = vector.extract_strided_slice %170 {offsets = [0, 32], sizes = [8, 32], strides = [1, 1]} : vector<8x64xf32> to vector<8x32xf32>
    %c32_57 = arith.constant 32 : index
    %c0_58 = arith.constant 0 : index
    %174 = vector.load %arg11[%c32_57, %c0_58] : memref<64x32xf32, #tpu.memory_space<vmem>>, vector<8x32xf32>
    tpu.vector_store %arg11[%c32_57, %c0_58], %173 {strides = array<i32>} : memref<64x32xf32, #tpu.memory_space<vmem>>, vector<8x32xf32>,
    %c32_59 = arith.constant 32 : index
    %c0_60 = arith.constant 0 : index
    %175 = vector.load %arg9[%c32_59, %c0_60] : memref<64x256xf32, #tpu.memory_space<vmem>>, vector<8x256xf32>
    %c24_61 = arith.constant 24 : index
    %c0_62 = arith.constant 0 : index
    %176 = vector.load %arg9[%c24_61, %c0_62] : memref<64x256xf32, #tpu.memory_space<vmem>>, vector<8x256xf32>
    %177 = arith.select %28, %175, %176 : vector<8x256xi1>, vector<8x256xf32>
    %178 = arith.truncf %170 : vector<8x64xf32> to vector<8x64xbf16>
    %c0_63 = arith.constant 0 : index
    %c0_64 = arith.constant 0 : index
    %179 = vector.load %arg2[%c0_63, %c0_64] : memref<64x256xbf16, #tpu.memory_space<vmem>>, vector<64x256xbf16>
    %cst_65 = arith.constant dense<0.000000e+00> : vector<8x256xf32>
    %180 = tpu.matmul %178, %179, %cst_65 {dimension_numbers = #tpu.dot_dimension_numbers<[1], [0], [0], [1], [0, 0, 1, 1], [], []>} : vector<8x64xbf16>, vector<64x256xbf16>, vector<8x256xf32> -> vector<8x256xf32>
    %181 = arith.addf %177, %180 : vector<8x256xf32>
    %182 = vector.extract_strided_slice %181 {offsets = [0, 0], sizes = [8, 64], strides = [1, 1]} : vector<8x256xf32> to vector<8x64xf32>
    %183 = arith.negf %182 : vector<8x64xf32>
    %184 = math.exp %183 : vector<8x64xf32>
    %cst_66 = arith.constant 1.000000e+00 : f32
    %185 = vector.broadcast %cst_66 : f32 to vector<8x64xf32>
    %186 = arith.addf %185, %184 : vector<8x64xf32>
    %187 = arith.divf %185, %186 : vector<8x64xf32>
    %188 = vector.extract_strided_slice %181 {offsets = [0, 64], sizes = [8, 64], strides = [1, 1]} : vector<8x256xf32> to vector<8x64xf32>
    %189 = arith.negf %188 : vector<8x64xf32>
    %190 = math.exp %189 : vector<8x64xf32>
    %cst_67 = arith.constant 1.000000e+00 : f32
    %191 = vector.broadcast %cst_67 : f32 to vector<8x64xf32>
    %192 = arith.addf %191, %190 : vector<8x64xf32>
    %193 = arith.divf %191, %192 : vector<8x64xf32>
    %194 = vector.extract_strided_slice %181 {offsets = [0, 128], sizes = [8, 64], strides = [1, 1]} : vector<8x256xf32> to vector<8x64xf32>
    %195 = math.tanh %194 : vector<8x64xf32>
    %196 = vector.extract_strided_slice %181 {offsets = [0, 192], sizes = [8, 64], strides = [1, 1]} : vector<8x256xf32> to vector<8x64xf32>
    %197 = arith.negf %196 : vector<8x64xf32>
    %198 = math.exp %197 : vector<8x64xf32>
    %cst_68 = arith.constant 1.000000e+00 : f32
    %199 = vector.broadcast %cst_68 : f32 to vector<8x64xf32>
    %200 = arith.addf %199, %198 : vector<8x64xf32>
    %201 = arith.divf %199, %200 : vector<8x64xf32>
    %202 = arith.mulf %193, %168 : vector<8x64xf32>
    %203 = arith.mulf %187, %195 : vector<8x64xf32>
    %204 = arith.addf %202, %203 : vector<8x64xf32>
    %205 = math.tanh %204 : vector<8x64xf32>
    %206 = arith.mulf %201, %205 : vector<8x64xf32>
    %207 = vector.extract_strided_slice %206 {offsets = [0, 0], sizes = [8, 32], strides = [1, 1]} : vector<8x64xf32> to vector<8x32xf32>
    %c32_69 = arith.constant 32 : index
    %c0_70 = arith.constant 0 : index
    %208 = vector.load %arg10[%c32_69, %c0_70] : memref<64x32xf32, #tpu.memory_space<vmem>>, vector<8x32xf32>
    tpu.vector_store %arg10[%c32_69, %c0_70], %207 {strides = array<i32>} : memref<64x32xf32, #tpu.memory_space<vmem>>, vector<8x32xf32>,
    %209 = vector.extract_strided_slice %206 {offsets = [0, 32], sizes = [8, 32], strides = [1, 1]} : vector<8x64xf32> to vector<8x32xf32>
    %c24_71 = arith.constant 24 : index
    %c0_72 = arith.constant 0 : index
    %210 = vector.load %arg11[%c24_71, %c0_72] : memref<64x32xf32, #tpu.memory_space<vmem>>, vector<8x32xf32>
    tpu.vector_store %arg11[%c24_71, %c0_72], %209 {strides = array<i32>} : memref<64x32xf32, #tpu.memory_space<vmem>>, vector<8x32xf32>,
    %c40_73 = arith.constant 40 : index
    %c0_74 = arith.constant 0 : index
    %211 = vector.load %arg9[%c40_73, %c0_74] : memref<64x256xf32, #tpu.memory_space<vmem>>, vector<8x256xf32>
    %c16_75 = arith.constant 16 : index
    %c0_76 = arith.constant 0 : index
    %212 = vector.load %arg9[%c16_75, %c0_76] : memref<64x256xf32, #tpu.memory_space<vmem>>, vector<8x256xf32>
    %213 = arith.select %28, %211, %212 : vector<8x256xi1>, vector<8x256xf32>
    %214 = arith.truncf %206 : vector<8x64xf32> to vector<8x64xbf16>
    %c0_77 = arith.constant 0 : index
    %c0_78 = arith.constant 0 : index
    %215 = vector.load %arg2[%c0_77, %c0_78] : memref<64x256xbf16, #tpu.memory_space<vmem>>, vector<64x256xbf16>
    %cst_79 = arith.constant dense<0.000000e+00> : vector<8x256xf32>
    %216 = tpu.matmul %214, %215, %cst_79 {dimension_numbers = #tpu.dot_dimension_numbers<[1], [0], [0], [1], [0, 0, 1, 1], [], []>} : vector<8x64xbf16>, vector<64x256xbf16>, vector<8x256xf32> -> vector<8x256xf32>
    %217 = arith.addf %213, %216 : vector<8x256xf32>
    %218 = vector.extract_strided_slice %217 {offsets = [0, 0], sizes = [8, 64], strides = [1, 1]} : vector<8x256xf32> to vector<8x64xf32>
    %219 = arith.negf %218 : vector<8x64xf32>
    %220 = math.exp %219 : vector<8x64xf32>
    %cst_80 = arith.constant 1.000000e+00 : f32
    %221 = vector.broadcast %cst_80 : f32 to vector<8x64xf32>
    %222 = arith.addf %221, %220 : vector<8x64xf32>
    %223 = arith.divf %221, %222 : vector<8x64xf32>
    %224 = vector.extract_strided_slice %217 {offsets = [0, 64], sizes = [8, 64], strides = [1, 1]} : vector<8x256xf32> to vector<8x64xf32>
    %225 = arith.negf %224 : vector<8x64xf32>
    %226 = math.exp %225 : vector<8x64xf32>
    %cst_81 = arith.constant 1.000000e+00 : f32
    %227 = vector.broadcast %cst_81 : f32 to vector<8x64xf32>
    %228 = arith.addf %227, %226 : vector<8x64xf32>
    %229 = arith.divf %227, %228 : vector<8x64xf32>
    %230 = vector.extract_strided_slice %217 {offsets = [0, 128], sizes = [8, 64], strides = [1, 1]} : vector<8x256xf32> to vector<8x64xf32>
    %231 = math.tanh %230 : vector<8x64xf32>
    %232 = vector.extract_strided_slice %217 {offsets = [0, 192], sizes = [8, 64], strides = [1, 1]} : vector<8x256xf32> to vector<8x64xf32>
    %233 = arith.negf %232 : vector<8x64xf32>
    %234 = math.exp %233 : vector<8x64xf32>
    %cst_82 = arith.constant 1.000000e+00 : f32
    %235 = vector.broadcast %cst_82 : f32 to vector<8x64xf32>
    %236 = arith.addf %235, %234 : vector<8x64xf32>
    %237 = arith.divf %235, %236 : vector<8x64xf32>
    %238 = arith.mulf %229, %204 : vector<8x64xf32>
    %239 = arith.mulf %223, %231 : vector<8x64xf32>
    %240 = arith.addf %238, %239 : vector<8x64xf32>
    %241 = math.tanh %240 : vector<8x64xf32>
    %242 = arith.mulf %237, %241 : vector<8x64xf32>
    %243 = vector.extract_strided_slice %242 {offsets = [0, 0], sizes = [8, 32], strides = [1, 1]} : vector<8x64xf32> to vector<8x32xf32>
    %c40_83 = arith.constant 40 : index
    %c0_84 = arith.constant 0 : index
    %244 = vector.load %arg10[%c40_83, %c0_84] : memref<64x32xf32, #tpu.memory_space<vmem>>, vector<8x32xf32>
    tpu.vector_store %arg10[%c40_83, %c0_84], %243 {strides = array<i32>} : memref<64x32xf32, #tpu.memory_space<vmem>>, vector<8x32xf32>,
    %245 = vector.extract_strided_slice %242 {offsets = [0, 32], sizes = [8, 32], strides = [1, 1]} : vector<8x64xf32> to vector<8x32xf32>
    %c16_85 = arith.constant 16 : index
    %c0_86 = arith.constant 0 : index
    %246 = vector.load %arg11[%c16_85, %c0_86] : memref<64x32xf32, #tpu.memory_space<vmem>>, vector<8x32xf32>
    tpu.vector_store %arg11[%c16_85, %c0_86], %245 {strides = array<i32>} : memref<64x32xf32, #tpu.memory_space<vmem>>, vector<8x32xf32>,
    %c48_87 = arith.constant 48 : index
    %c0_88 = arith.constant 0 : index
    %247 = vector.load %arg9[%c48_87, %c0_88] : memref<64x256xf32, #tpu.memory_space<vmem>>, vector<8x256xf32>
    %c8_89 = arith.constant 8 : index
    %c0_90 = arith.constant 0 : index
    %248 = vector.load %arg9[%c8_89, %c0_90] : memref<64x256xf32, #tpu.memory_space<vmem>>, vector<8x256xf32>
    %249 = arith.select %28, %247, %248 : vector<8x256xi1>, vector<8x256xf32>
    %250 = arith.truncf %242 : vector<8x64xf32> to vector<8x64xbf16>
    %c0_91 = arith.constant 0 : index
    %c0_92 = arith.constant 0 : index
    %251 = vector.load %arg2[%c0_91, %c0_92] : memref<64x256xbf16, #tpu.memory_space<vmem>>, vector<64x256xbf16>
    %cst_93 = arith.constant dense<0.000000e+00> : vector<8x256xf32>
    %252 = tpu.matmul %250, %251, %cst_93 {dimension_numbers = #tpu.dot_dimension_numbers<[1], [0], [0], [1], [0, 0, 1, 1], [], []>} : vector<8x64xbf16>, vector<64x256xbf16>, vector<8x256xf32> -> vector<8x256xf32>
    %253 = arith.addf %249, %252 : vector<8x256xf32>
    %254 = vector.extract_strided_slice %253 {offsets = [0, 0], sizes = [8, 64], strides = [1, 1]} : vector<8x256xf32> to vector<8x64xf32>
    %255 = arith.negf %254 : vector<8x64xf32>
    %256 = math.exp %255 : vector<8x64xf32>
    %cst_94 = arith.constant 1.000000e+00 : f32
    %257 = vector.broadcast %cst_94 : f32 to vector<8x64xf32>
    %258 = arith.addf %257, %256 : vector<8x64xf32>
    %259 = arith.divf %257, %258 : vector<8x64xf32>
    %260 = vector.extract_strided_slice %253 {offsets = [0, 64], sizes = [8, 64], strides = [1, 1]} : vector<8x256xf32> to vector<8x64xf32>
    %261 = arith.negf %260 : vector<8x64xf32>
    %262 = math.exp %261 : vector<8x64xf32>
    %cst_95 = arith.constant 1.000000e+00 : f32
    %263 = vector.broadcast %cst_95 : f32 to vector<8x64xf32>
    %264 = arith.addf %263, %262 : vector<8x64xf32>
    %265 = arith.divf %263, %264 : vector<8x64xf32>
    %266 = vector.extract_strided_slice %253 {offsets = [0, 128], sizes = [8, 64], strides = [1, 1]} : vector<8x256xf32> to vector<8x64xf32>
    %267 = math.tanh %266 : vector<8x64xf32>
    %268 = vector.extract_strided_slice %253 {offsets = [0, 192], sizes = [8, 64], strides = [1, 1]} : vector<8x256xf32> to vector<8x64xf32>
    %269 = arith.negf %268 : vector<8x64xf32>
    %270 = math.exp %269 : vector<8x64xf32>
    %cst_96 = arith.constant 1.000000e+00 : f32
    %271 = vector.broadcast %cst_96 : f32 to vector<8x64xf32>
    %272 = arith.addf %271, %270 : vector<8x64xf32>
    %273 = arith.divf %271, %272 : vector<8x64xf32>
    %274 = arith.mulf %265, %240 : vector<8x64xf32>
    %275 = arith.mulf %259, %267 : vector<8x64xf32>
    %276 = arith.addf %274, %275 : vector<8x64xf32>
    %277 = math.tanh %276 : vector<8x64xf32>
    %278 = arith.mulf %273, %277 : vector<8x64xf32>
    %279 = vector.extract_strided_slice %278 {offsets = [0, 0], sizes = [8, 32], strides = [1, 1]} : vector<8x64xf32> to vector<8x32xf32>
    %c48_97 = arith.constant 48 : index
    %c0_98 = arith.constant 0 : index
    %280 = vector.load %arg10[%c48_97, %c0_98] : memref<64x32xf32, #tpu.memory_space<vmem>>, vector<8x32xf32>
    tpu.vector_store %arg10[%c48_97, %c0_98], %279 {strides = array<i32>} : memref<64x32xf32, #tpu.memory_space<vmem>>, vector<8x32xf32>,
    %281 = vector.extract_strided_slice %278 {offsets = [0, 32], sizes = [8, 32], strides = [1, 1]} : vector<8x64xf32> to vector<8x32xf32>
    %c8_99 = arith.constant 8 : index
    %c0_100 = arith.constant 0 : index
    %282 = vector.load %arg11[%c8_99, %c0_100] : memref<64x32xf32, #tpu.memory_space<vmem>>, vector<8x32xf32>
    tpu.vector_store %arg11[%c8_99, %c0_100], %281 {strides = array<i32>} : memref<64x32xf32, #tpu.memory_space<vmem>>, vector<8x32xf32>,
    %c56_101 = arith.constant 56 : index
    %c0_102 = arith.constant 0 : index
    %283 = vector.load %arg9[%c56_101, %c0_102] : memref<64x256xf32, #tpu.memory_space<vmem>>, vector<8x256xf32>
    %c0_103 = arith.constant 0 : index
    %c0_104 = arith.constant 0 : index
    %284 = vector.load %arg9[%c0_103, %c0_104] : memref<64x256xf32, #tpu.memory_space<vmem>>, vector<8x256xf32>
    %285 = arith.select %28, %283, %284 : vector<8x256xi1>, vector<8x256xf32>
    %286 = arith.truncf %278 : vector<8x64xf32> to vector<8x64xbf16>
    %c0_105 = arith.constant 0 : index
    %c0_106 = arith.constant 0 : index
    %287 = vector.load %arg2[%c0_105, %c0_106] : memref<64x256xbf16, #tpu.memory_space<vmem>>, vector<64x256xbf16>
    %cst_107 = arith.constant dense<0.000000e+00> : vector<8x256xf32>
    %288 = tpu.matmul %286, %287, %cst_107 {dimension_numbers = #tpu.dot_dimension_numbers<[1], [0], [0], [1], [0, 0, 1, 1], [], []>} : vector<8x64xbf16>, vector<64x256xbf16>, vector<8x256xf32> -> vector<8x256xf32>
    %289 = arith.addf %285, %288 : vector<8x256xf32>
    %290 = vector.extract_strided_slice %289 {offsets = [0, 0], sizes = [8, 64], strides = [1, 1]} : vector<8x256xf32> to vector<8x64xf32>
    %291 = arith.negf %290 : vector<8x64xf32>
    %292 = math.exp %291 : vector<8x64xf32>
    %cst_108 = arith.constant 1.000000e+00 : f32
    %293 = vector.broadcast %cst_108 : f32 to vector<8x64xf32>
    %294 = arith.addf %293, %292 : vector<8x64xf32>
    %295 = arith.divf %293, %294 : vector<8x64xf32>
    %296 = vector.extract_strided_slice %289 {offsets = [0, 64], sizes = [8, 64], strides = [1, 1]} : vector<8x256xf32> to vector<8x64xf32>
    %297 = arith.negf %296 : vector<8x64xf32>
    %298 = math.exp %297 : vector<8x64xf32>
    %cst_109 = arith.constant 1.000000e+00 : f32
    %299 = vector.broadcast %cst_109 : f32 to vector<8x64xf32>
    %300 = arith.addf %299, %298 : vector<8x64xf32>
    %301 = arith.divf %299, %300 : vector<8x64xf32>
    %302 = vector.extract_strided_slice %289 {offsets = [0, 128], sizes = [8, 64], strides = [1, 1]} : vector<8x256xf32> to vector<8x64xf32>
    %303 = math.tanh %302 : vector<8x64xf32>
    %304 = vector.extract_strided_slice %289 {offsets = [0, 192], sizes = [8, 64], strides = [1, 1]} : vector<8x256xf32> to vector<8x64xf32>
    %305 = arith.negf %304 : vector<8x64xf32>
    %306 = math.exp %305 : vector<8x64xf32>
    %cst_110 = arith.constant 1.000000e+00 : f32
    %307 = vector.broadcast %cst_110 : f32 to vector<8x64xf32>
    %308 = arith.addf %307, %306 : vector<8x64xf32>
    %309 = arith.divf %307, %308 : vector<8x64xf32>
    %310 = arith.mulf %301, %276 : vector<8x64xf32>
    %311 = arith.mulf %295, %303 : vector<8x64xf32>
    %312 = arith.addf %310, %311 : vector<8x64xf32>
    %313 = math.tanh %312 : vector<8x64xf32>
    %314 = arith.mulf %309, %313 : vector<8x64xf32>
    %315 = vector.extract_strided_slice %314 {offsets = [0, 0], sizes = [8, 32], strides = [1, 1]} : vector<8x64xf32> to vector<8x32xf32>
    %c56_111 = arith.constant 56 : index
    %c0_112 = arith.constant 0 : index
    %316 = vector.load %arg10[%c56_111, %c0_112] : memref<64x32xf32, #tpu.memory_space<vmem>>, vector<8x32xf32>
    tpu.vector_store %arg10[%c56_111, %c0_112], %315 {strides = array<i32>} : memref<64x32xf32, #tpu.memory_space<vmem>>, vector<8x32xf32>,
    %317 = vector.extract_strided_slice %314 {offsets = [0, 32], sizes = [8, 32], strides = [1, 1]} : vector<8x64xf32> to vector<8x32xf32>
    %c0_113 = arith.constant 0 : index
    %c0_114 = arith.constant 0 : index
    %318 = vector.load %arg11[%c0_113, %c0_114] : memref<64x32xf32, #tpu.memory_space<vmem>>, vector<8x32xf32>
    tpu.vector_store %arg11[%c0_113, %c0_114], %317 {strides = array<i32>} : memref<64x32xf32, #tpu.memory_space<vmem>>, vector<8x32xf32>,
    %c0_115 = arith.constant 0 : index
    %c0_116 = arith.constant 0 : index
    %319 = vector.load %arg10[%c0_115, %c0_116] : memref<64x32xf32, #tpu.memory_space<vmem>>, vector<64x32xf32>
    %320 = arith.truncf %319 : vector<64x32xf32> to vector<64x32xbf16>
    %c0_117 = arith.constant 0 : index
    %c0_118 = arith.constant 0 : index
    %321 = vector.load %arg3[%c0_117, %c0_118] : memref<64x32xbf16, #tpu.memory_space<vmem>>, vector<32x32xbf16>
    %cst_119 = arith.constant dense<0.000000e+00> : vector<64x32xf32>
    %322 = tpu.matmul %320, %321, %cst_119 {dimension_numbers = #tpu.dot_dimension_numbers<[1], [0], [0], [1], [0, 0, 1, 1], [], []>} : vector<64x32xbf16>, vector<32x32xbf16>, vector<64x32xf32> -> vector<64x32xf32>
    %c0_120 = arith.constant 0 : index
    %c0_121 = arith.constant 0 : index
    %323 = vector.load %arg11[%c0_120, %c0_121] : memref<64x32xf32, #tpu.memory_space<vmem>>, vector<64x32xf32>
    %324 = arith.truncf %323 : vector<64x32xf32> to vector<64x32xbf16>
    %c32_122 = arith.constant 32 : index
    %c0_123 = arith.constant 0 : index
    %325 = vector.load %arg3[%c32_122, %c0_123] : memref<64x32xbf16, #tpu.memory_space<vmem>>, vector<32x32xbf16>
    %cst_124 = arith.constant dense<0.000000e+00> : vector<64x32xf32>
    %326 = tpu.matmul %324, %325, %cst_124 {dimension_numbers = #tpu.dot_dimension_numbers<[1], [0], [0], [1], [0, 0, 1, 1], [], []>} : vector<64x32xbf16>, vector<32x32xbf16>, vector<64x32xf32> -> vector<64x32xf32>
    %327 = arith.addf %322, %326 : vector<64x32xf32>
    %c0_125 = arith.constant 0 : index
    %c0_126 = arith.constant 0 : index
    %328 = vector.load %arg4[%c0_125, %c0_126] : memref<1x32xf32, #tpu.memory_space<vmem>>, vector<1x32xf32>
    %329 = vector.broadcast %328 : vector<1x32xf32> to vector<64x32xf32>
    %330 = arith.addf %327, %329 : vector<64x32xf32>
    %331 = math.tanh %330 : vector<64x32xf32>
    %c0_127 = arith.constant 0 : index
    %c0_128 = arith.constant 0 : index
    %332 = vector.load %arg7[%c0_127, %c0_128] : memref<64x32xf32, #tpu.memory_space<vmem>>, vector<64x32xf32>
    tpu.vector_store %arg7[%c0_127, %c0_128], %331 {strides = array<i32>} : memref<64x32xf32, #tpu.memory_space<vmem>>, vector<64x32xf32>,
    %333 = arith.truncf %314 : vector<8x64xf32> to vector<8x64xbf16>
    %c0_129 = arith.constant 0 : index
    %c0_130 = arith.constant 0 : index
    %334 = vector.load %arg5[%c0_129, %c0_130] : memref<64x32xbf16, #tpu.memory_space<vmem>>, vector<64x32xbf16>
    %cst_131 = arith.constant dense<0.000000e+00> : vector<8x32xf32>
    %335 = tpu.matmul %333, %334, %cst_131 {dimension_numbers = #tpu.dot_dimension_numbers<[1], [0], [0], [1], [0, 0, 1, 1], [], []>} : vector<8x64xbf16>, vector<64x32xbf16>, vector<8x32xf32> -> vector<8x32xf32>
    %c0_132 = arith.constant 0 : index
    %c0_133 = arith.constant 0 : index
    %336 = vector.load %arg6[%c0_132, %c0_133] : memref<1x32xf32, #tpu.memory_space<vmem>>, vector<1x32xf32>
    %337 = vector.broadcast %336 : vector<1x32xf32> to vector<8x32xf32>
    %338 = arith.addf %335, %337 : vector<8x32xf32>
    %339 = math.tanh %338 : vector<8x32xf32>
    %c0_134 = arith.constant 0 : index
    %c0_135 = arith.constant 0 : index
    %340 = vector.load %arg8[%c0_134, %c0_135] : memref<8x32xf32, #tpu.memory_space<vmem>>, vector<8x32xf32>
    tpu.vector_store %arg8[%c0_134, %c0_135], %339 {strides = array<i32>} : memref<8x32xf32, #tpu.memory_space<vmem>>, vector<8x32xf32>,
    return
  }
}

</mosaic_0001>

<bundles_post_ra>
// kernel: encoder_forward.1
= control target key start
LH: loop header
LB: loop body
LE: loop exit
PB: predicated region body
PF: predicated region fallthrough
CT: control target
= control target key end

     0   :  { %v2083_v0 = vmov 0   ;;  %v29_v33 = vlaneseq  ;;  %v2084_v38 = vmov 1.0|1.0   ;;  %vm357_vm14 = vcmask 523264   ;;  %s2086_s22 = smov 32   ;;  %s2659_s0 = inlined_call_operand.vmem [shape: s32[64,1], index: 0, kind: input, shape index: {}]   ;;  %s2660_s1 = inlined_call_operand.vmem [shape: bf16[128,256], index: 1, kind: input, shape index: {}]   ;;  %s2661_s2 = inlined_call_operand.vmem [shape: bf16[64,256], index: 2, kind: input, shape index: {}]   ;;  %s2662_s5 = inlined_call_operand.vmem [shape: bf16[64,32], index: 5, kind: input, shape index: {}]   ;;  %s2663_s3 = inlined_call_operand.vmem [shape: bf16[64,32], index: 3, kind: input, shape index: {}]   ;;  %s2664_s6 = inlined_call_operand.vmem [shape: f32[1,32], index: 6, kind: input, shape index: {}]   ;;  %s2665_s8 = inlined_call_operand.vmem [shape: f32[8,32], index: 8, kind: output, shape index: {1}]   ;;  %s2666_s4 = inlined_call_operand.vmem [shape: f32[1,32], index: 4, kind: input, shape index: {}]   ;;  %s2667_s7 = inlined_call_operand.vmem [shape: f32[64,32], index: 7, kind: output, shape index: {0}]  }
   0x1   :  { %1924 = vset.pattern.permute.xlu1 %v2083_v0  ;;  %1923 = vset.pattern.permute.xlu0 %v2083_v0  ;;  %v33_v1 = vld [vmem:[%s2659_s0 + $0x10] sm:$0xff]  ;;  %v31_v2 = vld [vmem:[%s2659_s0] sm:$0xff]  ;;  %v34_v3 = vld [vmem:[%s2659_s0 + $0x18] sm:$0xff]  ;;  %vm430_vm15 = vcmask 261120  }
   0x2   :  { %46 = vperm.xlu1 %1924, %v33_v1   ;;  %40 = vperm.xlu0 %1923, %v31_v2   ;;  %v32_v4 = vld [vmem:[%s2659_s0 + $0x8] sm:$0xff]  ;;  %v1928_v7 = vld [vmem:[%s2660_s1 + $0x14] ss:$8 sps:$4 sm:$0xff]   ;;  %v35_v9 = vld [vmem:[%s2659_s0 + $0x20] sm:$0xff]  ;;  %v30_v35 = vand.u32 127, %v29_v33 }
   0x3   :  { %219 = vmatprep.mubr.bf16.mxu0 %v2083_v0  ;;  %393 = vmatprep.mubr.bf16.mxu1 %v2083_v0  ;;  %v1925_v5 = vld [vmem:[%s2660_s1 + $0x4] ss:$8 sps:$4 sm:$0xff]   ;;  %v1927_v6 = vld [vmem:[%s2660_s1] ss:$8 sps:$4 sm:$0xff]   ;;  %v1930_v10 = vld [vmem:[%s2660_s1 + $0x10] ss:$8 sps:$4 sm:$0xff]  }
   0x4   :  { %v36_v8 = vld [vmem:[%s2659_s0 + $0x28] sm:$0xff]  ;;  %187 = vmatprep.subr.bf16.mxu0 %v1925_v5  ;;  %v38_v12 = vld [vmem:[%s2659_s0 + $0x38] sm:$0xff]  ;;  %v37_v13 = vld [vmem:[%s2659_s0 + $0x30] sm:$0xff]  ;;  %v276_v52 = vadd.s32 128, %v30_v35  ;;  %v281_v56 = vand.u32 63, %v30_v35 }
   0x5   :  { %188 = vmatpush1.bf16.msra.mxu0 %v1927_v6  ;;  %v1931_v11 = vld [vmem:[%s2660_s1 + $0x24] ss:$8 sps:$4 sm:$0xff]   ;;  %v1933_v14 = vld [vmem:[%s2660_s1 + $0x20] ss:$8 sps:$4 sm:$0xff]   ;;  %v1934_v15 = vld [vmem:[%s2660_s1 + $0x34] ss:$8 sps:$4 sm:$0xff]  }
   0x6   :  { %49 = vperm.xlu1 %1924, %v34_v3   ;;  %43 = vperm.xlu0 %1923, %v32_v4   ;;  %v1936_v16 = vld [vmem:[%s2660_s1 + $0x30] ss:$8 sps:$4 sm:$0xff]   ;;  %v1937_v17 = vld [vmem:[%s2660_s1 + $0x44] ss:$8 sps:$4 sm:$0xff]   ;;  %v2197_v19 = vld [vmem:[%s2661_s2] ss:$8 sps:$4 sm:$0xff]  }
   0x7   :  { %189 = vmatprep.subr.bf16.mxu0 %v1928_v7  ;;  %v2192_v18 = vld [vmem:[%s2661_s2 + $0x4] ss:$8 sps:$4 sm:$0xff]   ;;  %v2203_v20 = vld [vmem:[%s2661_s2 + $0x14] ss:$8 sps:$4 sm:$0xff]   ;;  %v2208_v21 = vld [vmem:[%s2661_s2 + $0x10] ss:$8 sps:$4 sm:$0xff]  }
   0x8   :  { %361 = vmatprep.subr.bf16.mxu1 %v2192_v18  ;;  %v1939_v22 = vld [vmem:[%s2660_s1 + $0x40] ss:$8 sps:$4 sm:$0xff]   ;;  %v1940_v23 = vld [vmem:[%s2660_s1 + $0x54] ss:$8 sps:$4 sm:$0xff]   ;;  %v2222_v24 = vld [vmem:[%s2661_s2 + $0x24] ss:$8 sps:$4 sm:$0xff]  }
   0x9   :  { %190 = vmatpush1.bf16.msra.mxu0 %v1930_v10  ;;  %362 = vmatpush1.bf16.msra.mxu1 %v2197_v19  ;;  %v1942_v25 = vld [vmem:[%s2660_s1 + $0x50] ss:$8 sps:$4 sm:$0xff]   ;;  %v2230_v26 = vld [vmem:[%s2661_s2 + $0x20] ss:$8 sps:$4 sm:$0xff]   ;;  %v1943_v27 = vld [vmem:[%s2660_s1 + $0x64] ss:$8 sps:$4 sm:$0xff]  }
   0xa   :  { %55 = vperm.xlu1 %1924, %v36_v8   ;;  %52 = vperm.xlu0 %1923, %v35_v9   ;;  %v2239_v28 = vld [vmem:[%s2661_s2 + $0x34] ss:$8 sps:$4 sm:$0xff]   ;;  %v2245_v29 = vld [vmem:[%s2661_s2 + $0x30] ss:$8 sps:$4 sm:$0xff]   ;;  %v1945_v30 = vld [vmem:[%s2660_s1 + $0x60] ss:$8 sps:$4 sm:$0xff]  }
   0xb   :  { %191 = vmatprep.subr.bf16.mxu0 %v1931_v11  ;;  %363 = vmatprep.subr.bf16.mxu1 %v2203_v20  ;;  %v1946_v31 = vld [vmem:[%s2660_s1 + $0x74] ss:$8 sps:$4 sm:$0xff]   ;;  %v1948_v32 = vld [vmem:[%s2660_s1 + $0x70] ss:$8 sps:$4 sm:$0xff]   ;;  %v288_v58 = vand.u32 63, %v276_v52  ;;  %vm2298_vm12 = vcmp.lt.s32.totalorder %v281_v56, 32 }
   0xc   :  { %s2085_s1 = smov 64   ;;  %v1962_v60 = vld [vmem:[%s2662_s5 + $0x8] sm:$0xff]  }
   0xd   :  { %192 = vmatpush1.bf16.msra.mxu0 %v1933_v14  ;;  %364 = vmatpush1.bf16.msra.mxu1 %v2208_v21  ;;  %vm2302_vm13 = vcmp.lt.s32.totalorder %v288_v58, 32 }
   0xe   :  { %61 = vperm.xlu1 %1924, %v38_v12   ;;  %58 = vperm.xlu0 %1923, %v37_v13  }
   0xf   :  { %193 = vmatprep.subr.bf16.mxu0 %v1934_v15  ;;  %365 = vmatprep.subr.bf16.mxu1 %v2222_v24 }
  0x11   :  { %194 = vmatpush1.bf16.msra.mxu0 %v1936_v16  ;;  %366 = vmatpush1.bf16.msra.mxu1 %v2230_v26 }
  0x12   :  { %195 = vmatprep.subr.bf16.mxu0 %v1937_v17  ;;  %367 = vmatprep.subr.bf16.mxu1 %v2239_v28 }
  0x15   :  { %196 = vmatpush1.bf16.msra.mxu0 %v1939_v22  ;;  %368 = vmatpush1.bf16.msra.mxu1 %v2245_v29 }
  0x16   :  { %197 = vmatprep.subr.bf16.mxu0 %v1940_v23  ;;  %497 = vmatprep.subr.bf16.mxu1 %v2192_v18 }
  0x18   :  { %394 = vmatmul.mubr.bf16.vlgmr.msra.gmra.mrb[0].mxu1 %v2083_v0 }
  0x19   :  { %198 = vmatpush1.bf16.msra.mxu0 %v1942_v25  ;;  %498 = vmatpush1.bf16.msra.mxu1 %v2197_v19 }
  0x1a   :  { %199 = vmatprep.subr.bf16.mxu0 %v1943_v27  ;;  %529 = vmatprep.mubr.bf16.mxu1 %v2083_v0 }
  0x1b   :  { %499 = vmatprep.subr.bf16.mxu1 %v2203_v20 }
  0x1d   :  { %200 = vmatpush1.bf16.msra.mxu0 %v1945_v30  ;;  %500 = vmatpush1.bf16.msra.mxu1 %v2208_v21 }
  0x1e   :  { %201 = vmatprep.subr.bf16.mxu0 %v1946_v31  ;;  %501 = vmatprep.subr.bf16.mxu1 %v2222_v24 }
  0x21   :  { %202 = vmatpush1.bf16.msra.mxu0 %v1948_v32  ;;  %502 = vmatpush1.bf16.msra.mxu1 %v2230_v26 }
  0x22   :  { %767 = vmatprep.subr.bf16.mxu0 %v2192_v18  ;;  %503 = vmatprep.subr.bf16.mxu1 %v2239_v28 }
  0x25   :  { %504 = vmatpush1.bf16.msra.mxu1 %v2245_v29 }
  0x26   :  { %632 = vmatprep.subr.bf16.mxu1 %v2192_v18 }
  0x81   :  { %v41_v34 = vpop.permute.xlu0 %40  ;;  %v47_v37 = vpop.permute.xlu1 %46 }
  0x82   :  { %vm63_vm1 = vcmp.eq.s32.totalorder %v41_v34, %v30_v35  ;;  %vm65_vm3 = vcmp.eq.s32.totalorder %v47_v37, %v30_v35 }
  0x85   :  { %v44_v36 = vpop.permute.xlu0 %43  ;;  %v50_v39 = vpop.permute.xlu1 %49 }
  0x86   :  { %vm64_vm0 = vcmp.eq.s32.totalorder %v44_v36, %v30_v35  ;;  %vm66_vm4 = vcmp.eq.s32.totalorder %v50_v39, %v30_v35 }
  0x87   :  { %vm1742_vm2 = vmpackc.low %vm64_vm0, %vm63_vm1  ;;  %vm2088_vm0 = vmmov 0  }
  0x88   :  { %1743 = vmatmul.mubr.msk.bf16.vlgmr.msra.gmra.mrb[0].mxu0 %vm1742_vm2, %v2084_v38  ;;  %vm1744_vm5 = vmpackc.low %vm66_vm4, %vm65_vm3 }
  0x89   :  { %229 = vmatprep.mubr.bf16.mxu0 %v2083_v0  ;;  %768 = vmatpush1.bf16.msra.mxu0 %v2197_v19  ;;  %v56_v40 = vpop.permute.xlu1 %55  ;;  %v53_v41 = vpop.permute.xlu0 %52 }
  0x8a   :  { %769 = vmatprep.subr.bf16.mxu0 %v2203_v20  ;;  %vm68_vm6 = vcmp.eq.s32.totalorder %v56_v40, %v30_v35  ;;  %vm67_vm7 = vcmp.eq.s32.totalorder %v53_v41, %v30_v35 }
  0x8b   :  { %vm1746_vm8 = vmpackc.low %vm68_vm6, %vm67_vm7 }
  0x8d   :  { %770 = vmatpush1.bf16.msra.mxu0 %v2208_v21  ;;  %v62_v42 = vpop.permute.xlu1 %61  ;;  %v59_v43 = vpop.permute.xlu0 %58 }
  0x8e   :  { %771 = vmatprep.subr.bf16.mxu0 %v2222_v24  ;;  %vm70_vm9 = vcmp.eq.s32.totalorder %v62_v42, %v30_v35  ;;  %vm69_vm10 = vcmp.eq.s32.totalorder %v59_v43, %v30_v35 }
  0x8f   :  { %vm1748_vm11 = vmpackc.low %vm70_vm9, %vm69_vm10 }
  0x90   :  { %1745 = vmatmul.mubr.msk.bf16.gmra.mrb[4].mxu0 %vm1744_vm5, %v2084_v38 }
  0x91   :  { %239 = vmatprep.mubr.bf16.mxu0 %v2083_v0  ;;  %772 = vmatpush1.bf16.msra.mxu0 %v2230_v26 }
  0x92   :  { %773 = vmatprep.subr.bf16.mxu0 %v2239_v28 }
  0x95   :  { %774 = vmatpush1.bf16.msra.mxu0 %v2245_v29 }
  0x96   :  { %1037 = vmatprep.subr.bf16.mxu0 %v2192_v18 }
  0x98   :  { %1747 = vmatmul.mubr.msk.bf16.gmra.mrb[8].mxu0 %vm1746_vm8, %v2084_v38 }
  0x99   :  { %249 = vmatprep.mubr.bf16.mxu0 %v2083_v0 }
  0xa0   :  { %1749 = vmatmul.mubr.msk.bf16.gmra.mrb[12].mxu0 %vm1748_vm11, %v2084_v38 }
  0xa1   :  { %799 = vmatprep.mubr.bf16.mxu0 %v2083_v0 }
  0xeb   :  { %v395_v44 = vpop.f32.mrb[0].mxu1 }
  0xec   :  { %v397_v45 = vpop.f32.mrb[1].mxu1 }
  0xed   :  { %v399_v46 = vpop.f32.mrb[2].mxu1 }
  0xee   :  { %v400_v47 = vpop.f32.mrb[3].mxu1 }
 0x15b   :  { %v2282_v48 = vpop.f32.mrb[0].mxu0 }
 0x15c   :  { %v2284_v49 = vpop.f32.mrb[1].mxu0 }
 0x15d   :  { %v2286_v50 = vpop.f32.mrb[2].mxu0 }
 0x15e   :  { %v2288_v51 = vpop.f32.mrb[3].mxu0 }
 0x163   :  { %v2290_v53 = vpop.f32.mrb[4].mxu0 }
 0x164   :  { %v2292_v54 = vpop.f32.mrb[5].mxu0 }
 0x165   :  { %v2294_v55 = vpop.f32.mrb[6].mxu0 }
 0x166   :  { %v2296_v57 = vpop.f32.mrb[7].mxu0 }
 0x16b   :  { %v2306_v61 = vpop.f32.mrb[8].mxu0 }
 0x16c   :  { %v2308_v62 = vpop.f32.mrb[9].mxu0  ;;  %v710_v63 = vsel %vm2298_vm12, %v2294_v55, %v2306_v61  ;;  %v845_v1 = vsel %vm2298_vm12, %v2306_v61, %v2294_v55 }
 0x16d   :  { %v2318_v2 = vpop.f32.mrb[10].mxu0  ;;  %v711_v3 = vsel %vm2302_vm13, %v2296_v57, %v2308_v62  ;;  %v846_v4 = vsel %vm2302_vm13, %v2308_v62, %v2296_v57 }
 0x16e   :  { %v2328_v5 = vpop.f32.mrb[11].mxu0  ;;  %v575_v6 = vsel %vm2298_vm12, %v2290_v53, %v2318_v2  ;;  %v980_v7 = vsel %vm2298_vm12, %v2318_v2, %v2290_v53 }
 0x16f   :  { %v576_v8 = vsel %vm2302_vm13, %v2292_v54, %v2328_v5  ;;  %v981_v9 = vsel %vm2302_vm13, %v2328_v5, %v2292_v54 }
 0x173   :  { %v2346_v10 = vpop.f32.mrb[12].mxu0 }
 0x174   :  { %v2348_v11 = vpop.f32.mrb[13].mxu0  ;;  %v440_v12 = vsel %vm2298_vm12, %v2286_v50, %v2346_v10  ;;  %v1115_v13 = vsel %vm2298_vm12, %v2346_v10, %v2286_v50 }
 0x175   :  { %v2358_v14 = vpop.f32.mrb[14].mxu0  ;;  %v441_v15 = vsel %vm2302_vm13, %v2288_v51, %v2348_v11  ;;  %v1116_v16 = vsel %vm2302_vm13, %v2348_v11, %v2288_v51 }
 0x176   :  { %v307_v17 = vsel %vm2298_vm12, %v2282_v48, %v2358_v14  ;;  %v2372_v22 = vpop.f32.mrb[15].mxu0  ;;  %v1250_v23 = vsel %vm2298_vm12, %v2358_v14, %v2282_v48  ;;  %v2087_v48 = vmov 0.0   ;;  %v1963_v14 = vld [vmem:[%s2662_s5 + $0x10] sm:$0xff]  }
 0x177   :  { %v402_v25 = vadd.f32 %v395_v44, %v307_v17  ;;  %v308_v27 = vsel %vm2302_vm13, %v2284_v49, %v2372_v22  ;;  %v1251_v30 = vsel %vm2302_vm13, %v2372_v22, %v2284_v49  ;;  %v1961_v49 = vld [vmem:[%s2662_s5] sm:$0xff]   ;;  %v1964_v22 = vld [vmem:[%s2662_s5 + $0x18] sm:$0xff]  }
 0x178   :  { %v403_v31 = vadd.f32 %v397_v45, %v308_v27 }
 0x179   :  { %v1758_v32 = vmul.f32 -1.442695, %v402_v25 }
 0x17a   :  { %v1759_v38 = vmul.f32 -1.442695, %v403_v31 }
 0x17b   :  { %1969 = vpow2.f32 %v1758_v32 }
 0x17c   :  { %1971 = vtanh.f32 %v403_v31 }
 0x185   :  { %v1970_v33 = vpop.eup %1969 }
 0x186   :  { %v407_v34 = vadd.f32 1.0, %v1970_v33  ;;  %v1972_v35 = vpop.eup %1971 }
 0x188   :  { %1973 = vrcp.f32 %v407_v34 }
 0x189   :  { %1975 = vpow2.f32 %v1759_v38 }
 0x192   :  { %v1974_v36 = vpop.eup %1973 }
 0x193   :  { %v418_v37 = vmul.f32 %v1974_v36, %v1972_v35  ;;  %v1976_v39 = vpop.eup %1975  ;;  %v417_v41 = vmul.f32 0.0, %v1974_v36 }
 0x194   :  { %v414_v40 = vadd.f32 1.0, %v1976_v39 }
 0x195   :  { %420 = vrot.lane.b32.xlu0 %v418_v37, %s2085_s1 }
 0x196   :  { %1977 = vrcp.f32 %v414_v40 }
 0x1a0   :  { %v1978_v44 = vpop.eup %1977 }
 0x207   :  { %v421_v42 = vpop.permute.xlu0 %420 }
 0x208   :  { %v423_v43 = vadd.f32 %v421_v42, %v417_v41 }
 0x20a   :  { %1979 = vtanh.f32 %v423_v43 }
 0x214   :  { %v1980_v45 = vpop.eup %1979 }
 0x215   :  { %v2387_v46 = vmul.f32 %v1980_v45, %v1978_v44 }
 0x217   :  { %v442_v47 = vpack.c.bf16 %v2387_v46, %v2387_v46 }
 0x219   :  { %452 = vrot.lane.b32.xlu1 %v442_v47, %s2085_s1 }
 0x28b   :  { %v453_v52 = vpop.permute.xlu1 %452 }
 0x28c   :  { %1768 = vmatmul.mubr.msk.bf16.vlgmr.msra.gmra.mrb[4].mxu1 %vm357_vm14, %v453_v52 }
 0x28d   :  { %633 = vmatpush1.bf16.msra.mxu1 %v2197_v19  ;;  %664 = vmatprep.mubr.bf16.mxu1 %v2083_v0 }
 0x28e   :  { %634 = vmatprep.subr.bf16.mxu1 %v2203_v20 }
 0x291   :  { %635 = vmatpush1.bf16.msra.mxu1 %v2208_v21 }
 0x292   :  { %636 = vmatprep.subr.bf16.mxu1 %v2222_v24 }
 0x295   :  { %637 = vmatpush1.bf16.msra.mxu1 %v2230_v26 }
 0x296   :  { %638 = vmatprep.subr.bf16.mxu1 %v2239_v28 }
 0x299   :  { %639 = vmatpush1.bf16.msra.mxu1 %v2245_v29 }
 0x29a   :  { %902 = vmatprep.subr.bf16.mxu1 %v2192_v18 }
 0x35f   :  { %v531_v56 = vpop.f32.mrb[4].mxu1 }
 0x360   :  { %v538_v58 = vadd.f32 %v531_v56, %v440_v12  ;;  %v533_v17 = vpop.f32.mrb[5].mxu1 }
 0x361   :  { %v539_v25 = vadd.f32 %v533_v17, %v441_v15  ;;  %v535_v27 = vpop.f32.mrb[6].mxu1 }
 0x362   :  { %v1769_v31 = vmul.f32 -1.442695, %v538_v58  ;;  %v536_v32 = vpop.f32.mrb[7].mxu1 }
 0x363   :  { %v1770_v38 = vmul.f32 -1.442695, %v539_v25 }
 0x364   :  { %1981 = vpow2.f32 %v1769_v31 }
 0x365   :  { %1983 = vtanh.f32 %v539_v25 }
 0x36e   :  { %v1982_v33 = vpop.eup %1981 }
 0x36f   :  { %v543_v34 = vadd.f32 1.0, %v1982_v33  ;;  %v1984_v35 = vpop.eup %1983 }
 0x371   :  { %1985 = vrcp.f32 %v543_v34 }
 0x372   :  { %1987 = vpow2.f32 %v1770_v38 }
 0x37b   :  { %v1986_v36 = vpop.eup %1985 }
 0x37c   :  { %v554_v37 = vmul.f32 %v1986_v36, %v1984_v35  ;;  %v1988_v39 = vpop.eup %1987  ;;  %v553_v12 = vmul.f32 %v1986_v36, %v423_v43 }
 0x37d   :  { %v550_v40 = vadd.f32 1.0, %v1988_v39 }
 0x37e   :  { %556 = vrot.lane.b32.xlu0 %v554_v37, %s2085_s1 }
 0x37f   :  { %1989 = vrcp.f32 %v550_v40 }
 0x389   :  { %v1990_v42 = vpop.eup %1989 }
 0x3f0   :  { %v557_v41 = vpop.permute.xlu0 %556 }
 0x3f1   :  { %v559_v15 = vadd.f32 %v557_v41, %v553_v12 }
 0x3f3   :  { %1991 = vtanh.f32 %v559_v15 }
 0x3fd   :  { %v1992_v44 = vpop.eup %1991 }
 0x3fe   :  { %v2403_v45 = vmul.f32 %v1992_v44, %v1990_v42 }
 0x400   :  { %v577_v47 = vpack.c.bf16 %v2403_v45, %v2403_v45 }
 0x402   :  { %587 = vrot.lane.b32.xlu1 %v577_v47, %s2085_s1 }
 0x474   :  { %v588_v52 = vpop.permute.xlu1 %587 }
 0x475   :  { %1779 = vmatmul.mubr.msk.bf16.vlgmr.msra.gmra.mrb[8].mxu1 %vm357_vm14, %v588_v52 }
 0x476   :  { %903 = vmatpush1.bf16.msra.mxu1 %v2197_v19  ;;  %934 = vmatprep.mubr.bf16.mxu1 %v2083_v0 }
 0x477   :  { %904 = vmatprep.subr.bf16.mxu1 %v2203_v20 }
 0x47a   :  { %905 = vmatpush1.bf16.msra.mxu1 %v2208_v21 }
 0x47b   :  { %906 = vmatprep.subr.bf16.mxu1 %v2222_v24 }
 0x47e   :  { %907 = vmatpush1.bf16.msra.mxu1 %v2230_v26 }
 0x47f   :  { %908 = vmatprep.subr.bf16.mxu1 %v2239_v28 }
 0x482   :  { %909 = vmatpush1.bf16.msra.mxu1 %v2245_v29 }
 0x483   :  { %1172 = vmatprep.subr.bf16.mxu1 %v2192_v18 }
 0x548   :  { %v666_v43 = vpop.f32.mrb[8].mxu1 }
 0x549   :  { %v673_v56 = vadd.f32 %v666_v43, %v575_v6  ;;  %v668_v58 = vpop.f32.mrb[9].mxu1 }
 0x54a   :  { %v674_v17 = vadd.f32 %v668_v58, %v576_v8  ;;  %v670_v25 = vpop.f32.mrb[10].mxu1 }
 0x54b   :  { %v1780_v27 = vmul.f32 -1.442695, %v673_v56  ;;  %v671_v31 = vpop.f32.mrb[11].mxu1 }
 0x54c   :  { %v1781_v6 = vmul.f32 -1.442695, %v674_v17 }
 0x54d   :  { %1993 = vpow2.f32 %v1780_v27 }
 0x54e   :  { %1995 = vtanh.f32 %v674_v17 }
 0x557   :  { %v1994_v32 = vpop.eup %1993 }
 0x558   :  { %v678_v33 = vadd.f32 1.0, %v1994_v32  ;;  %v1996_v34 = vpop.eup %1995 }
 0x55a   :  { %1997 = vrcp.f32 %v678_v33 }
 0x55b   :  { %1999 = vpow2.f32 %v1781_v6 }
 0x564   :  { %v1998_v35 = vpop.eup %1997 }
 0x565   :  { %v689_v36 = vmul.f32 %v1998_v35, %v1996_v34  ;;  %v2000_v37 = vpop.eup %1999  ;;  %v688_v39 = vmul.f32 %v1998_v35, %v559_v15 }
 0x566   :  { %v685_v38 = vadd.f32 1.0, %v2000_v37 }
 0x567   :  { %691 = vrot.lane.b32.xlu0 %v689_v36, %s2085_s1 }
 0x568   :  { %2001 = vrcp.f32 %v685_v38 }
 0x572   :  { %v2002_v12 = vpop.eup %2001 }
 0x5d9   :  { %v692_v40 = vpop.permute.xlu0 %691 }
 0x5da   :  { %v694_v8 = vadd.f32 %v692_v40, %v688_v39 }
 0x5dc   :  { %2003 = vtanh.f32 %v694_v8 }
 0x5e6   :  { %v2004_v41 = vpop.eup %2003 }
 0x5e7   :  { %v2429_v42 = vmul.f32 %v2004_v41, %v2002_v12 }
 0x5e9   :  { %v712_v44 = vpack.c.bf16 %v2429_v42, %v2429_v42 }
 0x5eb   :  { %722 = vrot.lane.b32.xlu1 %v712_v44, %s2085_s1 }
 0x65d   :  { %v723_v47 = vpop.permute.xlu1 %722 }
 0x65e   :  { %1790 = vmatmul.mubr.msk.bf16.vlgmr.msra.gmra.mrb[16].mxu0 %vm357_vm14, %v723_v47 }
 0x65f   :  { %1038 = vmatpush1.bf16.msra.mxu0 %v2197_v19  ;;  %1069 = vmatprep.mubr.bf16.mxu0 %v2083_v0 }
 0x660   :  { %1039 = vmatprep.subr.bf16.mxu0 %v2203_v20 }
 0x663   :  { %1040 = vmatpush1.bf16.msra.mxu0 %v2208_v21 }
 0x664   :  { %1041 = vmatprep.subr.bf16.mxu0 %v2222_v24 }
 0x667   :  { %1042 = vmatpush1.bf16.msra.mxu0 %v2230_v26 }
 0x668   :  { %1043 = vmatprep.subr.bf16.mxu0 %v2239_v28 }
 0x66b   :  { %1044 = vmatpush1.bf16.msra.mxu0 %v2245_v29 }
 0x66c   :  { %1307 = vmatprep.subr.bf16.mxu0 %v2192_v18 }
 0x731   :  { %v801_v15 = vpop.f32.mrb[16].mxu0 }
 0x732   :  { %v808_v52 = vadd.f32 %v801_v15, %v710_v63  ;;  %v803_v43 = vpop.f32.mrb[17].mxu0 }
 0x733   :  { %v809_v56 = vadd.f32 %v803_v43, %v711_v3  ;;  %v805_v58 = vpop.f32.mrb[18].mxu0 }
 0x734   :  { %v1791_v17 = vmul.f32 -1.442695, %v808_v52  ;;  %v806_v25 = vpop.f32.mrb[19].mxu0 }
 0x735   :  { %v1792_v63 = vmul.f32 -1.442695, %v809_v56 }
 0x736   :  { %2005 = vpow2.f32 %v1791_v17 }
 0x737   :  { %2007 = vtanh.f32 %v809_v56 }
 0x740   :  { %v2006_v27 = vpop.eup %2005 }
 0x741   :  { %v813_v18 = vadd.f32 1.0, %v2006_v27  ;;  %v2008_v31 = vpop.eup %2007 }
 0x743   :  { %2009 = vrcp.f32 %v813_v18 }
 0x744   :  { %2011 = vpow2.f32 %v1792_v63 }
 0x74d   :  { %v2010_v32 = vpop.eup %2009 }
 0x74e   :  { %v824_v33 = vmul.f32 %v2010_v32, %v2008_v31  ;;  %v2012_v34 = vpop.eup %2011  ;;  %v823_v36 = vmul.f32 %v2010_v32, %v694_v8 }
 0x74f   :  { %v820_v35 = vadd.f32 1.0, %v2012_v34 }
 0x750   :  { %826 = vrot.lane.b32.xlu0 %v824_v33, %s2085_s1 }
 0x751   :  { %2013 = vrcp.f32 %v820_v35 }
 0x75b   :  { %v2014_v37 = vpop.eup %2013 }
 0x7c2   :  { %v827_v6 = vpop.permute.xlu0 %826 }
 0x7c3   :  { %v829_v3 = vadd.f32 %v827_v6, %v823_v36 }
 0x7c5   :  { %2015 = vtanh.f32 %v829_v3 }
 0x7cf   :  { %v2016_v38 = vpop.eup %2015 }
 0x7d0   :  { %v2455_v39 = vmul.f32 %v2016_v38, %v2014_v37 }
 0x7d2   :  { %v847_v40 = vpack.c.bf16 %v2455_v39, %v2455_v39 }
 0x7d4   :  { %857 = vrot.lane.b32.xlu1 %v847_v40, %s2085_s1 }
 0x846   :  { %v858_v12 = vpop.permute.xlu1 %857 }
 0x847   :  { %1801 = vmatmul.mubr.msk.bf16.vlgmr.msra.gmra.mrb[12].mxu1 %vm357_vm14, %v858_v12 }
 0x848   :  { %1173 = vmatpush1.bf16.msra.mxu1 %v2197_v19  ;;  %1204 = vmatprep.mubr.bf16.mxu1 %v2083_v0 }
 0x849   :  { %1174 = vmatprep.subr.bf16.mxu1 %v2203_v20 }
 0x84c   :  { %1175 = vmatpush1.bf16.msra.mxu1 %v2208_v21 }
 0x84d   :  { %1176 = vmatprep.subr.bf16.mxu1 %v2222_v24 }
 0x850   :  { %1177 = vmatpush1.bf16.msra.mxu1 %v2230_v26 }
 0x851   :  { %1178 = vmatprep.subr.bf16.mxu1 %v2239_v28 }
 0x854   :  { %1179 = vmatpush1.bf16.msra.mxu1 %v2245_v29 }
 0x91a   :  { %v936_v8 = vpop.f32.mrb[12].mxu1 }
 0x91b   :  { %v943_v41 = vadd.f32 %v936_v8, %v845_v1  ;;  %v938_v44 = vpop.f32.mrb[13].mxu1 }
 0x91c   :  { %v944_v47 = vadd.f32 %v938_v44, %v846_v4  ;;  %v940_v15 = vpop.f32.mrb[14].mxu1 }
 0x91d   :  { %v1802_v52 = vmul.f32 -1.442695, %v943_v41  ;;  %v941_v43 = vpop.f32.mrb[15].mxu1 }
 0x91e   :  { %v1803_v55 = vmul.f32 -1.442695, %v944_v47 }
 0x91f   :  { %2017 = vpow2.f32 %v1802_v52 }
 0x920   :  { %2019 = vtanh.f32 %v944_v47 }
 0x929   :  { %v2018_v56 = vpop.eup %2017 }
 0x92a   :  { %v948_v58 = vadd.f32 1.0, %v2018_v56  ;;  %v2020_v17 = vpop.eup %2019 }
 0x92c   :  { %2021 = vrcp.f32 %v948_v58 }
 0x92d   :  { %2023 = vpow2.f32 %v1803_v55 }
 0x936   :  { %v2022_v25 = vpop.eup %2021 }
 0x937   :  { %v959_v27 = vmul.f32 %v2022_v25, %v2020_v17  ;;  %v2024_v61 = vpop.eup %2023  ;;  %v958_v18 = vmul.f32 %v2022_v25, %v829_v3 }
 0x938   :  { %v955_v1 = vadd.f32 1.0, %v2024_v61 }
 0x939   :  { %961 = vrot.lane.b32.xlu0 %v959_v27, %s2085_s1 }
 0x93a   :  { %2025 = vrcp.f32 %v955_v1 }
 0x944   :  { %v2026_v4 = vpop.eup %2025 }
 0x9ab   :  { %v962_v57 = vpop.permute.xlu0 %961 }
 0x9ac   :  { %v964_v62 = vadd.f32 %v962_v57, %v958_v18 }
 0x9ae   :  { %2027 = vtanh.f32 %v964_v62 }
 0x9b8   :  { %v2028_v31 = vpop.eup %2027 }
 0x9b9   :  { %v2480_v32 = vmul.f32 %v2028_v31, %v2026_v4 }
 0x9bb   :  { %v982_v33 = vpack.c.bf16 %v2480_v32, %v2480_v32 }
 0x9bd   :  { %992 = vrot.lane.b32.xlu1 %v982_v33, %s2085_s1 }
 0xa2f   :  { %v993_v63 = vpop.permute.xlu1 %992 }
 0xa30   :  { %1812 = vmatmul.mubr.msk.bf16.vlgmr.msra.gmra.mrb[20].mxu0 %vm357_vm14, %v993_v63 }
 0xa31   :  { %1308 = vmatpush1.bf16.msra.mxu0 %v2197_v19  ;;  %1339 = vmatprep.mubr.bf16.mxu0 %v2083_v0 }
 0xa32   :  { %1309 = vmatprep.subr.bf16.mxu0 %v2203_v20 }
 0xa35   :  { %1310 = vmatpush1.bf16.msra.mxu0 %v2208_v21 }
 0xa36   :  { %1311 = vmatprep.subr.bf16.mxu0 %v2222_v24 }
 0xa39   :  { %1312 = vmatpush1.bf16.msra.mxu0 %v2230_v26 }
 0xa3a   :  { %1313 = vmatprep.subr.bf16.mxu0 %v2239_v28 }
 0xa3d   :  { %1314 = vmatpush1.bf16.msra.mxu0 %v2245_v29 }
 0xa3e   :  { %1897 = vmatprep.subr.bf16.mxu0 %v2087_v48 }
 0xb03   :  { %v1071_v34 = vpop.f32.mrb[20].mxu0 }
 0xb04   :  { %v1078_v19 = vadd.f32 %v1071_v34, %v980_v7  ;;  %v1073_v0 = vpop.f32.mrb[21].mxu0 }
 0xb05   :  { %v1079_v20 = vadd.f32 %v1073_v0, %v981_v9  ;;  %v1075_v21 = vpop.f32.mrb[22].mxu0 }
 0xb06   :  { %v1813_v24 = vmul.f32 -1.442695, %v1078_v19  ;;  %v1076_v26 = vpop.f32.mrb[23].mxu0 }
 0xb07   :  { %v1814_v53 = vmul.f32 -1.442695, %v1079_v20 }
 0xb08   :  { %2029 = vpow2.f32 %v1813_v24 }
 0xb09   :  { %2031 = vtanh.f32 %v1079_v20 }
 0xb12   :  { %v2030_v28 = vpop.eup %2029 }
 0xb13   :  { %v1083_v29 = vadd.f32 1.0, %v2030_v28  ;;  %v2032_v35 = vpop.eup %2031 }
 0xb15   :  { %2033 = vrcp.f32 %v1083_v29 }
 0xb16   :  { %2035 = vpow2.f32 %v1814_v53 }
 0xb1f   :  { %v2034_v36 = vpop.eup %2033 }
 0xb20   :  { %v1094_v6 = vmul.f32 %v2034_v36, %v2032_v35  ;;  %v2036_v2 = vpop.eup %2035  ;;  %v1093_v3 = vmul.f32 %v2034_v36, %v964_v62 }
 0xb21   :  { %v1090_v7 = vadd.f32 1.0, %v2036_v2 }
 0xb22   :  { %1096 = vrot.lane.b32.xlu0 %v1094_v6, %s2085_s1 }
 0xb23   :  { %2037 = vrcp.f32 %v1090_v7 }
 0xb2d   :  { %v2038_v9 = vpop.eup %2037 }
 0xb94   :  { %v1097_v54 = vpop.permute.xlu0 %1096 }
 0xb95   :  { %v1099_v5 = vadd.f32 %v1097_v54, %v1093_v3  ;;  %v1965_v3 = vld [vmem:[%s2663_s3 + $0x10] sm:$0xff]   ;;  %v1966_v54 = vld [vmem:[%s2663_s3 + $0x18] sm:$0xff]  }
 0xb96   :  { %1873 = vmatprep.subr.bf16.mxu1 %v1965_v3 }
 0xb97   :  { %2039 = vtanh.f32 %v1099_v5 }
 0xba1   :  { %v2040_v37 = vpop.eup %2039 }
 0xba2   :  { %v2505_v38 = vmul.f32 %v2040_v37, %v2038_v9 }
 0xba4   :  { %v1117_v40 = vpack.c.bf16 %v2505_v38, %v2505_v38 }
 0xba6   :  { %1127 = vrot.lane.b32.xlu1 %v1117_v40, %s2085_s1  ;;  %v1967_v40 = vld [vmem:[%s2663_s3] sm:$0xff]  }
 0xc18   :  { %v1128_v12 = vpop.permute.xlu1 %1127 }
 0xc19   :  { %1823 = vmatmul.mubr.msk.bf16.vlgmr.msra.gmra.mrb[16].mxu1 %vm357_vm14, %v1128_v12 }
 0xc1a   :  { %1874 = vmatpush3.bf16.msra.mxu1 %v1965_v3 }
 0xc1b   :  { %1875 = vmatprep.subr.bf16.mxu1 %v1966_v54 }
 0xc1e   :  { %1876 = vmatpush3.bf16.msra.mxu1 %v1966_v54 }
 0xc1f   :  { %1885 = vmatprep.subr.bf16.mxu1 %v1967_v40 }
 0xcec   :  { %v1206_v8 = vpop.f32.mrb[16].mxu1 }
 0xced   :  { %v1213_v41 = vadd.f32 %v1206_v8, %v1115_v13  ;;  %v1208_v44 = vpop.f32.mrb[17].mxu1 }
 0xcee   :  { %v1214_v47 = vadd.f32 %v1208_v44, %v1116_v16  ;;  %v1210_v15 = vpop.f32.mrb[18].mxu1 }
 0xcef   :  { %v1824_v52 = vmul.f32 -1.442695, %v1213_v41  ;;  %v1211_v43 = vpop.f32.mrb[19].mxu1 }
 0xcf0   :  { %v1825_v50 = vmul.f32 -1.442695, %v1214_v47 }
 0xcf1   :  { %2041 = vpow2.f32 %v1824_v52 }
 0xcf2   :  { %2043 = vtanh.f32 %v1214_v47 }
 0xcfb   :  { %v2042_v56 = vpop.eup %2041 }
 0xcfc   :  { %v1218_v58 = vadd.f32 1.0, %v2042_v56  ;;  %v2044_v17 = vpop.eup %2043 }
 0xcfe   :  { %2045 = vrcp.f32 %v1218_v58  ;;  %v1968_v58 = vld [vmem:[%s2663_s3 + $0x8] sm:$0xff]  }
 0xcff   :  { %2047 = vpow2.f32 %v1825_v50 }
 0xd08   :  { %v2046_v25 = vpop.eup %2045 }
 0xd09   :  { %v1229_v27 = vmul.f32 %v2046_v25, %v2044_v17  ;;  %v2048_v10 = vpop.eup %2047  ;;  %v1228_v55 = vmul.f32 %v2046_v25, %v1099_v5 }
 0xd0a   :  { %v1225_v13 = vadd.f32 1.0, %v2048_v10 }
 0xd0b   :  { %1231 = vrot.lane.b32.xlu0 %v1229_v27, %s2085_s1 }
 0xd0c   :  { %2049 = vrcp.f32 %v1225_v13 }
 0xd16   :  { %v2050_v16 = vpop.eup %2049 }
 0xd7d   :  { %v1232_v51 = vpop.permute.xlu0 %1231 }
 0xd7e   :  { %v2522_v11 = vadd.f32 %v1232_v51, %v1228_v55 }
 0xd80   :  { %2051 = vtanh.f32 %v2522_v11 }
 0xd8a   :  { %v2052_v61 = vpop.eup %2051 }
 0xd8b   :  { %v1236_v1 = vmul.f32 %v2052_v61, %v2050_v16 }
 0xd8d   :  { %v1252_v18 = vpack.c.bf16 %v1236_v1, %v1236_v1 }
 0xd8f   :  { %1262 = vrot.lane.b32.xlu1 %v1252_v18, %s2085_s1 }
 0xd93   :  { %1242 = vrot.lane.b32.xlu1 %v1236_v1, %s2086_s22 }
 0xd97   :  { %972 = vrot.lane.b32.xlu1 %v2480_v32, %s2086_s22 }
 0xd9b   :  { %702 = vrot.lane.b32.xlu1 %v2429_v42, %s2086_s22 }
 0xd9f   :  { %432 = vrot.lane.b32.xlu1 %v2387_v46, %s2086_s22 }
 0xda3   :  { %427 = vrot.lane.b32.xlu1 %v2387_v46, %s2085_s1 }
 0xda7   :  { %698 = vrot.lane.b32.xlu1 %v2429_v42, %s2085_s1 }
 0xdab   :  { %968 = vrot.lane.b32.xlu1 %v2480_v32, %s2085_s1 }
 0xdaf   :  { %1238 = vrot.lane.b32.xlu1 %v1236_v1, %s2085_s1 }
 0xe01   :  { %v1263_v57 = vpop.permute.xlu1 %1262 }
 0xe02   :  { %1834 = vmatmul.mubr.msk.bf16.vlgmr.msra.gmra.mrb[24].mxu0 %vm357_vm14, %v1263_v57 }
 0xe03   :  { %1898 = vmatpush3.bf16.msra.mxu0 %v1961_v49  ;;  %1905 = vmatprep.mubr.msk.bf16.mxu0 %vm2088_vm0, %v2087_v48 }
 0xe04   :  { %1899 = vmatprep.subr.bf16.mxu0 %v2087_v48 }
 0xe05   :  { %v1243_v62 = vpop.permute.xlu1 %1242 }
 0xe06   :  { %1245 = vst.msk [vmem:[#allocation4 + $0x8] sm:$0xff] %vm430_vm15, %v1243_v62 }
 0xe07   :  { %1900 = vmatpush3.bf16.msra.mxu0 %v1962_v60 }
 0xe08   :  { %1901 = vmatprep.subr.bf16.mxu0 %v2087_v48 }
 0xe09   :  { %v973_v4 = vpop.permute.xlu1 %972 }
 0xe0a   :  { %975 = vst.msk [vmem:[#allocation4 + $0x18] sm:$0xff] %vm430_vm15, %v973_v4 }
 0xe0b   :  { %1902 = vmatpush3.bf16.msra.mxu0 %v1963_v14 }
 0xe0c   :  { %1903 = vmatprep.subr.bf16.mxu0 %v2087_v48 }
 0xe0d   :  { %v703_v31 = vpop.permute.xlu1 %702 }
 0xe0e   :  { %705 = vst.msk [vmem:[#allocation4 + $0x28] sm:$0xff] %vm430_vm15, %v703_v31 }
 0xe0f   :  { %1904 = vmatpush3.bf16.msra.mxu0 %v1964_v22 }
 0xe11   :  { %v433_v46 = vpop.permute.xlu1 %432  ;;  %v1400_v43 = vld [vmem:[#allocation4 + $0x18] sm:$0xff] }
 0xe12   :  { %435 = vst.msk [vmem:[#allocation4 + $0x38] sm:$0xff] %vm430_vm15, %v433_v46 }
 0xe15   :  { %v428_v42 = vpop.permute.xlu1 %427  ;;  %v1402_v27 = vld [vmem:[#allocation4 + $0x28] sm:$0xff] }
 0xe16   :  { %431 = vst.msk [vmem:[#allocation3] sm:$0xff] %vm430_vm15, %v428_v42 }
 0xe19   :  { %v699_v32 = vpop.permute.xlu1 %698  ;;  %v1404_v55 = vld [vmem:[#allocation4 + $0x38] sm:$0xff] }
 0xe1a   :  { %701 = vst.msk [vmem:[#allocation3 + $0x10] sm:$0xff] %vm430_vm15, %v699_v32 }
 0xe1d   :  { %v969_v33 = vpop.permute.xlu1 %968  ;;  %v1381_v16 = vld [vmem:[#allocation3] sm:$0xff] }
 0xe1e   :  { %971 = vst.msk [vmem:[#allocation3 + $0x20] sm:$0xff] %vm430_vm15, %v969_v33 }
 0xe21   :  { %v1239_v63 = vpop.permute.xlu1 %1238  ;;  %v1383_v57 = vld [vmem:[#allocation3 + $0x10] sm:$0xff] }
 0xe22   :  { %1241 = vst.msk [vmem:[#allocation3 + $0x30] sm:$0xff] %vm430_vm15, %v1239_v63 }
 0xe25   :  { %v1385_v31 = vld [vmem:[#allocation3 + $0x20] sm:$0xff] }
 0xe29   :  { %v1387_v32 = vld [vmem:[#allocation3 + $0x30] sm:$0xff] }
 0xed5   :  { %v1341_v34 = vpop.f32.mrb[24].mxu0 }
 0xed6   :  { %v1348_v19 = vadd.f32 %v1341_v34, %v1250_v23  ;;  %v1343_v0 = vpop.f32.mrb[25].mxu0  ;;  %v1850_v34 = vld [vmem:[%s2664_s6] ss:$0 sm:$0xff] }
 0xed7   :  { %v1349_v20 = vadd.f32 %v1343_v0, %v1251_v30  ;;  %v1345_v21 = vpop.f32.mrb[26].mxu0 }
 0xed8   :  { %v1835_v24 = vmul.f32 -1.442695, %v1348_v19  ;;  %v1346_v26 = vpop.f32.mrb[27].mxu0 }
 0xed9   :  { %v1836_v23 = vmul.f32 -1.442695, %v1349_v20 }
 0xeda   :  { %2053 = vpow2.f32 %v1835_v24 }
 0xedb   :  { %2055 = vtanh.f32 %v1349_v20 }
 0xee4   :  { %v2054_v28 = vpop.eup %2053 }
 0xee5   :  { %v1353_v29 = vadd.f32 1.0, %v2054_v28  ;;  %v2056_v59 = vpop.eup %2055  ;;  %v1849_v28 = vld [vmem:[%s2666_s4] ss:$0 sm:$0xff] }
 0xee7   :  { %2057 = vrcp.f32 %v1353_v29 }
 0xee8   :  { %2059 = vpow2.f32 %v1836_v23 }
 0xef1   :  { %v2058_v35 = vpop.eup %2057 }
 0xef2   :  { %v1364_v36 = vmul.f32 %v2058_v35, %v2056_v59  ;;  %v2060_v30 = vpop.eup %2059  ;;  %v1363_v53 = vmul.f32 %v2058_v35, %v2522_v11 }
 0xef3   :  { %v1360_v6 = vadd.f32 1.0, %v2060_v30 }
 0xef4   :  { %1366 = vrot.lane.b32.xlu0 %v1364_v36, %s2085_s1 }
 0xef5   :  { %2061 = vrcp.f32 %v1360_v6 }
 0xeff   :  { %v2062_v5 = vpop.eup %2061 }
 0xf66   :  { %v1367_v2 = vpop.permute.xlu0 %1366 }
 0xf67   :  { %v1369_v7 = vadd.f32 %v1367_v2, %v1363_v53 }
 0xf69   :  { %2063 = vtanh.f32 %v1369_v7 }
 0xf73   :  { %v2064_v9 = vpop.eup %2063 }
 0xf74   :  { %v1371_v37 = vmul.f32 %v2064_v9, %v2062_v5 }
 0xf76   :  { %1377 = vrot.lane.b32.xlu0 %v1371_v37, %s2086_s22  ;;  %v1622_v12 = vpack.c.bf16 %v1371_v37, %v1371_v37 }
 0xf78   :  { %1639 = vrot.lane.b32.xlu1 %v1622_v12, %s2085_s1 }
 0xf7a   :  { %1107 = vrot.lane.b32.xlu0 %v2505_v38, %s2086_s22 }
 0xf7e   :  { %837 = vrot.lane.b32.xlu0 %v2455_v39, %s2086_s22 }
 0xf82   :  { %567 = vrot.lane.b32.xlu0 %v2403_v45, %s2086_s22 }
 0xf86   :  { %563 = vrot.lane.b32.xlu0 %v2403_v45, %s2085_s1  ;;  %v1398_v45 = vld [vmem:[#allocation4 + $0x8] sm:$0xff] }
 0xf8a   :  { %833 = vrot.lane.b32.xlu0 %v2455_v39, %s2085_s1 }
 0xf8e   :  { %1103 = vrot.lane.b32.xlu0 %v2505_v38, %s2085_s1 }
 0xf92   :  { %1373 = vrot.lane.b32.xlu0 %v1371_v37, %s2085_s1 }
 0xfe8   :  { %v1378_v8 = vpop.permute.xlu0 %1377 }
 0xfe9   :  { %1380 = vst.msk [vmem:[#allocation4] sm:$0xff] %vm430_vm15, %v1378_v8 }
 0xfea   :  { %v1640_v41 = vpop.permute.xlu1 %1639 }
 0xfeb   :  { %1906 = vmatmul.mubr.msk.bf16.vlgmr.msra.gmra.mrb[28].mxu0 %vm357_vm14, %v1640_v41 }
 0xfec   :  { %v1108_v44 = vpop.permute.xlu0 %1107 }
 0xfed   :  { %1110 = vst.msk [vmem:[#allocation4 + $0x10] sm:$0xff] %vm430_vm15, %v1108_v44 }
 0xff0   :  { %v838_v47 = vpop.permute.xlu0 %837  ;;  %v1397_v15 = vld [vmem:[#allocation4] sm:$0xff] }
 0xff1   :  { %840 = vst.msk [vmem:[#allocation4 + $0x20] sm:$0xff] %vm430_vm15, %v838_v47  ;;  %v1405_v39 = vpack.c.bf16 %v1398_v45, %v1397_v15 }
 0xff3   :  { %1877 = vmatprep.mubr.msk.bf16.mxu1 %vm430_vm15, %v1405_v39 }
 0xff4   :  { %v568_v38 = vpop.permute.xlu0 %567  ;;  %v1399_v52 = vld [vmem:[#allocation4 + $0x10] sm:$0xff] }
 0xff5   :  { %570 = vst.msk [vmem:[#allocation4 + $0x30] sm:$0xff] %vm430_vm15, %v568_v38  ;;  %v1406_v56 = vpack.c.bf16 %v1400_v43, %v1399_v52 }
 0xff7   :  { %1878 = vmatmul.mubr.msk.bf16.vlgmr.msra.gmra.mrb[20].mxu1 %vm430_vm15, %v1406_v56 }
 0xff8   :  { %1886 = vmatpush3.bf16.msra.mxu1 %v1967_v40  ;;  %v564_v17 = vpop.permute.xlu0 %563  ;;  %v1401_v25 = vld [vmem:[#allocation4 + $0x20] sm:$0xff] }
 0xff9   :  { %566 = vst.msk [vmem:[#allocation3 + $0x8] sm:$0xff] %vm430_vm15, %v564_v17  ;;  %v1407_v50 = vpack.c.bf16 %v1402_v27, %v1401_v25  ;;  %1887 = vmatprep.subr.bf16.mxu1 %v1968_v58 }
 0xffb   :  { %1881 = vmatprep.mubr.msk.bf16.mxu1 %vm430_vm15, %v1407_v50 }
 0xffc   :  { %v834_v10 = vpop.permute.xlu0 %833  ;;  %v1403_v13 = vld [vmem:[#allocation4 + $0x30] sm:$0xff]  ;;  %1888 = vmatpush3.bf16.msra.mxu1 %v1968_v58 }
 0xffd   :  { %836 = vst.msk [vmem:[#allocation3 + $0x18] sm:$0xff] %vm430_vm15, %v834_v10  ;;  %v1408_v51 = vpack.c.bf16 %v1404_v55, %v1403_v13 }
 0xfff   :  { %1882 = vmatmul.mubr.msk.bf16.gmra.mrb[24].mxu1 %vm430_vm15, %v1408_v51 }
0x1000   :  { %v1104_v11 = vpop.permute.xlu0 %1103  ;;  %v1382_v61 = vld [vmem:[#allocation3 + $0x8] sm:$0xff] }
0x1001   :  { %1106 = vst.msk [vmem:[#allocation3 + $0x28] sm:$0xff] %vm430_vm15, %v1104_v11  ;;  %v1389_v1 = vpack.c.bf16 %v1382_v61, %v1381_v16 }
0x1003   :  { %1889 = vmatprep.mubr.msk.bf16.mxu1 %vm430_vm15, %v1389_v1 }
0x1004   :  { %v1374_v18 = vpop.permute.xlu0 %1373  ;;  %v1384_v62 = vld [vmem:[#allocation3 + $0x18] sm:$0xff] }
0x1005   :  { %1376 = vst.msk [vmem:[#allocation3 + $0x38] sm:$0xff] %vm430_vm15, %v1374_v18  ;;  %v1390_v4 = vpack.c.bf16 %v1384_v62, %v1383_v57 }
0x1007   :  { %1890 = vmatmul.mubr.msk.bf16.vlgmr.msra.gmra.mrb[20].mxu1 %vm430_vm15, %v1390_v4 }
0x1008   :  { %v1386_v46 = vld [vmem:[#allocation3 + $0x28] sm:$0xff] }
0x1009   :  { %v1391_v42 = vpack.c.bf16 %v1386_v46, %v1385_v31 }
0x100b   :  { %1893 = vmatprep.mubr.msk.bf16.mxu1 %vm430_vm15, %v1391_v42 }
0x100c   :  { %v1388_v33 = vld [vmem:[#allocation3 + $0x38] sm:$0xff] }
0x100d   :  { %v1392_v63 = vpack.c.bf16 %v1388_v33, %v1387_v32 }
0x100f   :  { %1894 = vmatmul.mubr.msk.bf16.gmra.mrb[24].mxu1 %vm430_vm15, %v1392_v63 }
0x10be   :  { %v1702_v19 = vpop.f32.mrb[28].mxu0 }
0x10bf   :  { %v1703_v0 = vadd.f32 %v1850_v34, %v1702_v19  ;;  %v1907_v20 = vpop.f32.mrb[29].mxu0 }
0x10c0   :  { %v1705_v21 = vpop.f32.mrb[30].mxu0 }
0x10c1   :  { %2065 = vtanh.f32 %v1703_v0  ;;  %v1908_v24 = vpop.f32.mrb[31].mxu0 }
0x10cb   :  { %v2066_v26 = vpop.eup %2065 }
0x10cc   :  { %1709 = vst.msk [vmem:[%s2665_s8] sm:$0xff] %vm430_vm15, %v2066_v26 }
0x10da   :  { %v1891_v29 = vpop.f32.mrb[20].mxu1 }
0x10db   :  { %v1600_v59 = vadd.f32 %v1891_v29, %v1849_v28  ;;  %v1560_v35 = vpop.f32.mrb[21].mxu1 }
0x10dc   :  { %v1598_v36 = vadd.f32 %v1849_v28, %v1560_v35  ;;  %v1892_v48 = vpop.f32.mrb[22].mxu1 }
0x10dd   :  { %2067 = vtanh.f32 %v1600_v59  ;;  %v1601_v49 = vadd.f32 %v1892_v48, %v1849_v28  ;;  %v1563_v60 = vpop.f32.mrb[23].mxu1 }
0x10de   :  { %2069 = vtanh.f32 %v1598_v36  ;;  %v1599_v14 = vadd.f32 %v1849_v28, %v1563_v60 }
0x10df   :  { %2071 = vtanh.f32 %v1601_v49 }
0x10e0   :  { %2073 = vtanh.f32 %v1599_v14 }
0x10e2   :  { %v1895_v22 = vpop.f32.mrb[24].mxu1 }
0x10e3   :  { %v1604_v23 = vadd.f32 %v1895_v22, %v1849_v28  ;;  %v1576_v30 = vpop.f32.mrb[25].mxu1 }
0x10e4   :  { %v1602_v6 = vadd.f32 %v1849_v28, %v1576_v30  ;;  %v1896_v53 = vpop.f32.mrb[26].mxu1 }
0x10e5   :  { %2075 = vtanh.f32 %v1604_v23  ;;  %v1605_v2 = vadd.f32 %v1896_v53, %v1849_v28  ;;  %v1579_v7 = vpop.f32.mrb[27].mxu1 }
0x10e6   :  { %2077 = vtanh.f32 %v1602_v6  ;;  %v1603_v3 = vadd.f32 %v1849_v28, %v1579_v7 }
0x10e7   :  { %v2068_v54 = vpop.eup %2067  ;;  %2079 = vtanh.f32 %v1605_v2 }
0x10e8   :  { %v2070_v5 = vpop.eup %2069  ;;  %1616 = vst.msk [vmem:[%s2667_s7 + $0x10] sm:$0xff] %vm430_vm15, %v2068_v54  ;;  %2081 = vtanh.f32 %v1603_v3 }
0x10e9   :  { %v2072_v9 = vpop.eup %2071  ;;  %1614 = vst.msk [vmem:[%s2667_s7] sm:$0xff] %vm430_vm15, %v2070_v5 }
0x10ea   :  { %v2074_v37 = vpop.eup %2073  ;;  %1617 = vst.msk [vmem:[%s2667_s7 + $0x18] sm:$0xff] %vm430_vm15, %v2072_v9 }
0x10eb   :  { %1615 = vst.msk [vmem:[%s2667_s7 + $0x8] sm:$0xff] %vm430_vm15, %v2074_v37 }
0x10ef   :  { %v2076_v40 = vpop.eup %2075 }
0x10f0   :  { %v2078_v12 = vpop.eup %2077  ;;  %1620 = vst.msk [vmem:[%s2667_s7 + $0x30] sm:$0xff] %vm430_vm15, %v2076_v40 }
0x10f1   :  { %v2080_v8 = vpop.eup %2079  ;;  %1618 = vst.msk [vmem:[%s2667_s7 + $0x20] sm:$0xff] %vm430_vm15, %v2078_v12 }
0x10f2   :  { %v2082_v41 = vpop.eup %2081  ;;  %1621 = vst.msk [vmem:[%s2667_s7 + $0x38] sm:$0xff] %vm430_vm15, %v2080_v8 }
0x10f3   :  { %1619 = vst.msk [vmem:[%s2667_s7 + $0x28] sm:$0xff] %vm430_vm15, %v2082_v41 }

</bundles_post_ra>
